<compile_context>
chip_gen: v6e
topology: v6e:2x2x1
jax: 0.10.0
libtpu: 0.0.40
codegen_flags: <defaults>
</compile_context>

<pallas_src>
import jax
import jax.numpy as jnp
from jax.experimental import pallas as pl
from jax.experimental.pallas import tpu as pltpu

EPS = 1e-5
K = 3      # kernel_size
PAD = 1    # padding


# ----------------------------------------------------------------------------
# Kernel 1: 3x3x3 conv (+bias) for one batch item, lane-dense (H, W*Cout)
#           output per depth, plus f32 [sum, sumsq] partials for BatchNorm.
# ----------------------------------------------------------------------------
def _conv_kernel(x_ref, w_ref, b_ref, y_ref, stats_ref):
    # x_ref:     (D+2, H+2, (W+2)*Cin) bf16  zero-padded volume, lane = w*Cin + ci
    # w_ref:     (9, (W+2)*Cin, W*Cout) bf16 banded weights (kw folded into band)
    # b_ref:     (1, W*Cout) f32             bias broadcast over the W groups
    # y_ref:     (D, H, W*Cout) bf16         conv output (lane-dense)
    # stats_ref: (2, W*Cout) f32             per-n partial [sum, sumsq]
    dp2, hp2, _ = x_ref.shape
    d_out = dp2 - 2 * PAD
    h_out = hp2 - 2 * PAD
    _, w_cout = b_ref.shape

    s1 = jnp.zeros((1, w_cout), jnp.float32)
    s2 = jnp.zeros((1, w_cout), jnp.float32)

    for d in range(d_out):                      # static unroll (small D)
        acc = jnp.zeros((h_out, w_cout), jnp.float32)
        for kd in range(K):
            for kh in range(K):
                acc += jnp.dot(x_ref[d + kd, pl.ds(kh, h_out), :],
                               w_ref[kd * K + kh],
                               preferred_element_type=jnp.float32)
        acc = acc + b_ref[...]                  # broadcast (1, W*Cout)
        y_ref[d] = acc.astype(y_ref.dtype)      # lane-dense bf16 store
        s1 = s1 + jnp.sum(acc, axis=0, keepdims=True)
        s2 = s2 + jnp.sum(acc * acc, axis=0, keepdims=True)

    stats_ref[0:1, :] = s1
    stats_ref[1:2, :] = s2


# ----------------------------------------------------------------------------
# Kernel 2: fused scale/shift (BatchNorm folded into per-lane scale/shift) + ReLU
#           over lane-dense 2-D blocks.
# ----------------------------------------------------------------------------
def _bn_relu_kernel(y_ref, scale_ref, shift_ref, o_ref):
    # y_ref: (rows, W*Cout) bf16;  scale/shift: (1, W*Cout) f32;  o_ref f32
    y = y_ref[...].astype(jnp.float32)
    o_ref[...] = jnp.maximum(y * scale_ref[...] + shift_ref[...], 0.0)


# ----------------------------------------------------------------------------
# Glue: 2x linear upsample along one axis, align_corners=False
# (same arithmetic as F.interpolate with scale_factor=2).
# ----------------------------------------------------------------------------
def _upsample2x(x, axis):
    n = x.shape[axis]
    j = jnp.arange(2 * n, dtype=jnp.float32)
    src = jnp.maximum((j + 0.5) / 2.0 - 0.5, 0.0)
    lo = jnp.floor(src).astype(jnp.int32)
    hi = jnp.minimum(lo + 1, n - 1)
    w_hi = src - lo.astype(jnp.float32)
    w_lo = 1.0 - w_hi
    shape = [1] * x.ndim
    shape[axis] = 2 * n
    x_lo = jnp.take(x, lo, axis=axis)
    x_hi = jnp.take(x, hi, axis=axis)
    return x_lo * w_lo.reshape(shape) + x_hi * w_hi.reshape(shape)


def _vmem_limit_bytes():
    """Generation-aware VMEM limit: ~75% of physical (96 MiB on v5e/v6e,
    48 MiB on v7x); conservative 48 MiB fallback if the query fails."""
    try:
        cap = int(pltpu.get_tpu_info().vmem_capacity_bytes)
    except Exception:
        cap = 0
    if cap <= 0:
        cap = 64 * 1024 * 1024
    return max(32 * 1024 * 1024, int(cap * 0.75))


def _pick_row_block(total_rows, row_bytes, budget_bytes):
    """Largest row-block that divides total_rows, is a multiple of 8, and fits
    the budget; falls back to the full extent (always legal)."""
    cap = max(8, budget_bytes // max(row_bytes, 1))
    if total_rows <= cap:
        return total_rows
    best = None
    r = 8
    while r <= cap:
        if total_rows % r == 0:
            best = r
        r += 8
    return best if best is not None else total_rows


# ----------------------------------------------------------------------------
# Wrapper: full UpBlock3d forward.
# ----------------------------------------------------------------------------
def up_block_3d(x_ncdhw, weight, bias, gamma, beta):
    # x_ncdhw: (N, Cin, D, H0, W0); weight: (Cout, Cin, 3, 3, 3) (PyTorch layout)
    N, Cin, D, H0, W0 = x_ncdhw.shape
    Cout = weight.shape[0]
    H, W = 2 * H0, 2 * W0
    WCin = (W + 2 * PAD) * Cin
    WCout = W * Cout
    vmem_limit = _vmem_limit_bytes()

    # --- upsample + pad + lane-dense layout (XLA glue) -----------------------
    x = jnp.transpose(x_ncdhw, (0, 2, 3, 4, 1)).astype(jnp.float32)  # NDHWC
    x = _upsample2x(x, axis=2)
    x = _upsample2x(x, axis=3)                                       # (N,D,H,W,Cin)
    x = jnp.pad(x, ((0, 0), (PAD, PAD), (PAD, PAD), (PAD, PAD), (0, 0)))
    x = x.reshape(N, D + 2 * PAD, H + 2 * PAD, WCin).astype(jnp.bfloat16)

    # --- banded weights: fold the kw tap and W position into the band --------
    # wband[kd*3+kh, (w+kw)*Cin + ci, w*Cout + co] = weight[co, ci, kd, kh, kw]
    wt = jnp.transpose(weight, (2, 3, 4, 1, 0)).astype(jnp.float32)  # (kd,kh,kw,Ci,Co)
    shift = jnp.zeros((K, W + 2 * PAD, W), jnp.float32)
    eye_w = jnp.eye(W, dtype=jnp.float32)
    for kw in range(K):
        shift = shift.at[kw, kw:kw + W, :].set(eye_w)
    wband = jnp.einsum('kpw,dhkio->dhpiwo', shift, wt)
    wband = wband.reshape(K * K, WCin, WCout).astype(jnp.bfloat16)
    b2 = jnp.tile(bias.astype(jnp.float32), W).reshape(1, WCout)

    # --- conv + partial BN stats ---------------------------------------------
    conv_out, stats = pl.pallas_call(
        _conv_kernel,
        out_shape=(
            jax.ShapeDtypeStruct((N, D, H, WCout), jnp.bfloat16),
            jax.ShapeDtypeStruct((N, 2, WCout), jnp.float32),
        ),
        grid=(N,),
        in_specs=[
            pl.BlockSpec((pl.Squeezed(), D + 2 * PAD, H + 2 * PAD, WCin),
                         lambda n: (n, 0, 0, 0)),
            pl.BlockSpec((K * K, WCin, WCout), lambda n: (0, 0, 0)),
            pl.BlockSpec((1, WCout), lambda n: (0, 0)),
        ],
        out_specs=(
            pl.BlockSpec((pl.Squeezed(), D, H, WCout), lambda n: (n, 0, 0, 0)),
            pl.BlockSpec((pl.Squeezed(), 2, WCout), lambda n: (n, 0, 0)),
        ),
        compiler_params=pltpu.CompilerParams(
            dimension_semantics=("parallel",),
            vmem_limit_bytes=vmem_limit),
    )(x, wband, b2)

    # --- hierarchical (parallel-Welford) BN statistic combine in JAX ---------
    cnt_b = float(D * H * W)                             # elements per batch item
    s = stats.reshape(N, 2, W, Cout).sum(axis=2)         # fold W groups -> (N,2,Cout)
    sum_b, sq_b = s[:, 0, :], s[:, 1, :]
    mean_b = sum_b / cnt_b
    m2_b = jnp.maximum(sq_b - cnt_b * mean_b * mean_b, 0.0)
    total = float(N) * cnt_b
    mean = jnp.sum(sum_b, axis=0) / total
    var = (jnp.sum(m2_b, axis=0)
           + cnt_b * jnp.sum((mean_b - mean) ** 2, axis=0)) / total
    inv = jax.lax.rsqrt(var + EPS)
    scale_c = gamma.astype(jnp.float32) * inv
    shift_c = beta.astype(jnp.float32) - mean * scale_c
    scale2 = jnp.tile(scale_c, W).reshape(1, WCout)       # lane = w*Cout + c
    shift2 = jnp.tile(shift_c, W).reshape(1, WCout)

    # --- fused BN + ReLU over lane-dense rows --------------------------------
    R = N * D * H
    y2 = conv_out.reshape(R, WCout)                       # contiguous, free reshape
    br = _pick_row_block(R, WCout * 12, vmem_limit // 2)  # bf16 in + f32 out, 2x buf

    out2 = pl.pallas_call(
        _bn_relu_kernel,
        out_shape=jax.ShapeDtypeStruct((R, WCout), jnp.float32),
        grid=(R // br,),
        in_specs=[
            pl.BlockSpec((br, WCout), lambda i: (i, 0)),
            pl.BlockSpec((1, WCout), lambda i: (0, 0)),
            pl.BlockSpec((1, WCout), lambda i: (0, 0)),
        ],
        out_specs=pl.BlockSpec((br, WCout), lambda i: (i, 0)),
        compiler_params=pltpu.CompilerParams(
            dimension_semantics=("parallel",),
            vmem_limit_bytes=vmem_limit),
    )(y2, scale2, shift2)

    out = out2.reshape(N, D, H, W, Cout)
    return jnp.transpose(out, (0, 4, 1, 2, 3))            # back to NCDHW


# ----------------------------------------------------------------------------
# Pure-JAX reference (PyTorch forward semantics, with the same bf16 rounding of
# conv inputs/weights/intermediate as the kernel; accumulation is f32 in both).
# ----------------------------------------------------------------------------
def _reference(x_ncdhw, weight, bias, gamma, beta):
    x = x_ncdhw.astype(jnp.float32)
    x = _upsample2x(x, axis=3)
    x = _upsample2x(x, axis=4)
    x = x.astype(jnp.bfloat16).astype(jnp.float32)
    w = weight.astype(jnp.bfloat16).astype(jnp.float32)
    y = jax.lax.conv_general_dilated(
        x, w, window_strides=(1, 1, 1),
        padding=((PAD, PAD), (PAD, PAD), (PAD, PAD)),
        dimension_numbers=("NCDHW", "OIDHW", "NCDHW"))
    y = y + bias.reshape(1, -1, 1, 1, 1)
    mean = jnp.mean(y, axis=(0, 2, 3, 4), keepdims=True)
    var = jnp.mean((y - mean) ** 2, axis=(0, 2, 3, 4), keepdims=True)
    yq = y.astype(jnp.bfloat16).astype(jnp.float32)   # match bf16 intermediate
    yn = (yq - mean) * jax.lax.rsqrt(var + EPS)
    yn = yn * gamma.reshape(1, -1, 1, 1, 1) + beta.reshape(1, -1, 1, 1, 1)
    return jnp.maximum(yn, 0.0)


if __name__ == "__main__":
    key = jax.random.PRNGKey(0)
    k1, k2, k3, k4, k5 = jax.random.split(key, 5)

    N, Cin, D, H0, W0 = 2, 4, 4, 8, 8   # small NCDHW input
    Cout = 8

    x = jax.random.normal(k1, (N, Cin, D, H0, W0), jnp.float32)
    weight = 0.1 * jax.random.normal(k2, (Cout, Cin, K, K, K), jnp.float32)
    bias = 0.1 * jax.random.normal(k3, (Cout,), jnp.float32)
    gamma = 1.0 + 0.1 * jax.random.normal(k4, (Cout,), jnp.float32)
    beta = 0.1 * jax.random.normal(k5, (Cout,), jnp.float32)

    out = up_block_3d(x, weight, bias, gamma, beta)
    out = jax.block_until_ready(out)

    assert out.shape == (N, Cout, D, 2 * H0, 2 * W0), out.shape

    ref = _reference(x, weight, bias, gamma, beta)
    max_err = float(jnp.max(jnp.abs(out - ref)))
    assert max_err < 2e-3, f"max abs error vs reference: {max_err}"

    print("KERNEL_OK")
</pallas_src>

<mosaic_0001>
module attributes {stable_mosaic.version = 11 : i64} {
  func.func @_conv_kernel(%arg0: i32, %arg1: memref<1x6x18x72xbf16, #tpu.memory_space<vmem>>, %arg2: memref<9x72x128xbf16, #tpu.memory_space<vmem>>, %arg3: memref<1x128xf32, #tpu.memory_space<vmem>>, %arg4: memref<1x4x16x128xbf16, #tpu.memory_space<vmem>>, %arg5: memref<1x2x128xf32, #tpu.memory_space<vmem>>) attributes {dimension_semantics = [#tpu.dimension_semantics<parallel>], iteration_bounds = array<i64: 2>, scalar_prefetch = 0 : i64, scratch_operands = 0 : i64, tpu.core_type = #tpu.core_type<tc>, window_params = [{transform_indices = @transform_0, window_bounds = array<i64: 1, 6, 18, 72>}, {pipeline_mode = #tpu.pipeline_mode<synchronous>, transform_indices = @transform_1, window_bounds = array<i64: 9, 72, 128>}, {pipeline_mode = #tpu.pipeline_mode<synchronous>, transform_indices = @transform_2, window_bounds = array<i64: 1, 128>}, {transform_indices = @transform_3, window_bounds = array<i64: 1, 4, 16, 128>}, {transform_indices = @transform_4, window_bounds = array<i64: 1, 2, 128>}]} {
    %cst = arith.constant 0.000000e+00 : f32
    %0 = vector.broadcast %cst : f32 to vector<1x128xf32>
    %cst_0 = arith.constant 0.000000e+00 : f32
    %1 = vector.broadcast %cst_0 : f32 to vector<1x128xf32>
    %cst_1 = arith.constant 0.000000e+00 : f32
    %2 = vector.broadcast %cst_1 : f32 to vector<16x128xf32>
    %c0 = arith.constant 0 : index
    %c0_2 = arith.constant 0 : index
    %c0_3 = arith.constant 0 : index
    %c0_4 = arith.constant 0 : index
    %3 = vector.load %arg1[%c0, %c0_2, %c0_3, %c0_4] : memref<1x6x18x72xbf16, #tpu.memory_space<vmem>>, vector<1x1x16x72xbf16>
    %4 = vector.shape_cast %3 : vector<1x1x16x72xbf16> to vector<16x72xbf16>
    %c0_5 = arith.constant 0 : index
    %c0_6 = arith.constant 0 : index
    %c0_7 = arith.constant 0 : index
    %5 = vector.load %arg2[%c0_5, %c0_6, %c0_7] : memref<9x72x128xbf16, #tpu.memory_space<vmem>>, vector<1x72x128xbf16>
    %6 = vector.shape_cast %5 : vector<1x72x128xbf16> to vector<72x128xbf16>
    %cst_8 = arith.constant dense<0.000000e+00> : vector<16x128xf32>
    %7 = tpu.matmul %4, %6, %cst_8 {dimension_numbers = #tpu.dot_dimension_numbers<[1], [0], [0], [1], [0, 0, 1, 1], [], []>} : vector<16x72xbf16>, vector<72x128xbf16>, vector<16x128xf32> -> vector<16x128xf32>
    %8 = arith.addf %2, %7 : vector<16x128xf32>
    %c0_9 = arith.constant 0 : index
    %c0_10 = arith.constant 0 : index
    %c1 = arith.constant 1 : index
    %c0_11 = arith.constant 0 : index
    %9 = vector.load %arg1[%c0_9, %c0_10, %c1, %c0_11] : memref<1x6x18x72xbf16, #tpu.memory_space<vmem>>, vector<1x1x16x72xbf16>
    %10 = vector.shape_cast %9 : vector<1x1x16x72xbf16> to vector<16x72xbf16>
    %c1_12 = arith.constant 1 : index
    %c0_13 = arith.constant 0 : index
    %c0_14 = arith.constant 0 : index
    %11 = vector.load %arg2[%c1_12, %c0_13, %c0_14] : memref<9x72x128xbf16, #tpu.memory_space<vmem>>, vector<1x72x128xbf16>
    %12 = vector.shape_cast %11 : vector<1x72x128xbf16> to vector<72x128xbf16>
    %cst_15 = arith.constant dense<0.000000e+00> : vector<16x128xf32>
    %13 = tpu.matmul %10, %12, %cst_15 {dimension_numbers = #tpu.dot_dimension_numbers<[1], [0], [0], [1], [0, 0, 1, 1], [], []>} : vector<16x72xbf16>, vector<72x128xbf16>, vector<16x128xf32> -> vector<16x128xf32>
    %14 = arith.addf %8, %13 : vector<16x128xf32>
    %c0_16 = arith.constant 0 : index
    %c0_17 = arith.constant 0 : index
    %c2 = arith.constant 2 : index
    %c0_18 = arith.constant 0 : index
    %15 = vector.load %arg1[%c0_16, %c0_17, %c2, %c0_18] : memref<1x6x18x72xbf16, #tpu.memory_space<vmem>>, vector<1x1x16x72xbf16>
    %16 = vector.shape_cast %15 : vector<1x1x16x72xbf16> to vector<16x72xbf16>
    %c2_19 = arith.constant 2 : index
    %c0_20 = arith.constant 0 : index
    %c0_21 = arith.constant 0 : index
    %17 = vector.load %arg2[%c2_19, %c0_20, %c0_21] : memref<9x72x128xbf16, #tpu.memory_space<vmem>>, vector<1x72x128xbf16>
    %18 = vector.shape_cast %17 : vector<1x72x128xbf16> to vector<72x128xbf16>
    %cst_22 = arith.constant dense<0.000000e+00> : vector<16x128xf32>
    %19 = tpu.matmul %16, %18, %cst_22 {dimension_numbers = #tpu.dot_dimension_numbers<[1], [0], [0], [1], [0, 0, 1, 1], [], []>} : vector<16x72xbf16>, vector<72x128xbf16>, vector<16x128xf32> -> vector<16x128xf32>
    %20 = arith.addf %14, %19 : vector<16x128xf32>
    %c0_23 = arith.constant 0 : index
    %c1_24 = arith.constant 1 : index
    %c0_25 = arith.constant 0 : index
    %c0_26 = arith.constant 0 : index
    %21 = vector.load %arg1[%c0_23, %c1_24, %c0_25, %c0_26] : memref<1x6x18x72xbf16, #tpu.memory_space<vmem>>, vector<1x1x16x72xbf16>
    %22 = vector.shape_cast %21 : vector<1x1x16x72xbf16> to vector<16x72xbf16>
    %c3 = arith.constant 3 : index
    %c0_27 = arith.constant 0 : index
    %c0_28 = arith.constant 0 : index
    %23 = vector.load %arg2[%c3, %c0_27, %c0_28] : memref<9x72x128xbf16, #tpu.memory_space<vmem>>, vector<1x72x128xbf16>
    %24 = vector.shape_cast %23 : vector<1x72x128xbf16> to vector<72x128xbf16>
    %cst_29 = arith.constant dense<0.000000e+00> : vector<16x128xf32>
    %25 = tpu.matmul %22, %24, %cst_29 {dimension_numbers = #tpu.dot_dimension_numbers<[1], [0], [0], [1], [0, 0, 1, 1], [], []>} : vector<16x72xbf16>, vector<72x128xbf16>, vector<16x128xf32> -> vector<16x128xf32>
    %26 = arith.addf %20, %25 : vector<16x128xf32>
    %c0_30 = arith.constant 0 : index
    %c1_31 = arith.constant 1 : index
    %c1_32 = arith.constant 1 : index
    %c0_33 = arith.constant 0 : index
    %27 = vector.load %arg1[%c0_30, %c1_31, %c1_32, %c0_33] : memref<1x6x18x72xbf16, #tpu.memory_space<vmem>>, vector<1x1x16x72xbf16>
    %28 = vector.shape_cast %27 : vector<1x1x16x72xbf16> to vector<16x72xbf16>
    %c4 = arith.constant 4 : index
    %c0_34 = arith.constant 0 : index
    %c0_35 = arith.constant 0 : index
    %29 = vector.load %arg2[%c4, %c0_34, %c0_35] : memref<9x72x128xbf16, #tpu.memory_space<vmem>>, vector<1x72x128xbf16>
    %30 = vector.shape_cast %29 : vector<1x72x128xbf16> to vector<72x128xbf16>
    %cst_36 = arith.constant dense<0.000000e+00> : vector<16x128xf32>
    %31 = tpu.matmul %28, %30, %cst_36 {dimension_numbers = #tpu.dot_dimension_numbers<[1], [0], [0], [1], [0, 0, 1, 1], [], []>} : vector<16x72xbf16>, vector<72x128xbf16>, vector<16x128xf32> -> vector<16x128xf32>
    %32 = arith.addf %26, %31 : vector<16x128xf32>
    %c0_37 = arith.constant 0 : index
    %c1_38 = arith.constant 1 : index
    %c2_39 = arith.constant 2 : index
    %c0_40 = arith.constant 0 : index
    %33 = vector.load %arg1[%c0_37, %c1_38, %c2_39, %c0_40] : memref<1x6x18x72xbf16, #tpu.memory_space<vmem>>, vector<1x1x16x72xbf16>
    %34 = vector.shape_cast %33 : vector<1x1x16x72xbf16> to vector<16x72xbf16>
    %c5 = arith.constant 5 : index
    %c0_41 = arith.constant 0 : index
    %c0_42 = arith.constant 0 : index
    %35 = vector.load %arg2[%c5, %c0_41, %c0_42] : memref<9x72x128xbf16, #tpu.memory_space<vmem>>, vector<1x72x128xbf16>
    %36 = vector.shape_cast %35 : vector<1x72x128xbf16> to vector<72x128xbf16>
    %cst_43 = arith.constant dense<0.000000e+00> : vector<16x128xf32>
    %37 = tpu.matmul %34, %36, %cst_43 {dimension_numbers = #tpu.dot_dimension_numbers<[1], [0], [0], [1], [0, 0, 1, 1], [], []>} : vector<16x72xbf16>, vector<72x128xbf16>, vector<16x128xf32> -> vector<16x128xf32>
    %38 = arith.addf %32, %37 : vector<16x128xf32>
    %c0_44 = arith.constant 0 : index
    %c2_45 = arith.constant 2 : index
    %c0_46 = arith.constant 0 : index
    %c0_47 = arith.constant 0 : index
    %39 = vector.load %arg1[%c0_44, %c2_45, %c0_46, %c0_47] : memref<1x6x18x72xbf16, #tpu.memory_space<vmem>>, vector<1x1x16x72xbf16>
    %40 = vector.shape_cast %39 : vector<1x1x16x72xbf16> to vector<16x72xbf16>
    %c6 = arith.constant 6 : index
    %c0_48 = arith.constant 0 : index
    %c0_49 = arith.constant 0 : index
    %41 = vector.load %arg2[%c6, %c0_48, %c0_49] : memref<9x72x128xbf16, #tpu.memory_space<vmem>>, vector<1x72x128xbf16>
    %42 = vector.shape_cast %41 : vector<1x72x128xbf16> to vector<72x128xbf16>
    %cst_50 = arith.constant dense<0.000000e+00> : vector<16x128xf32>
    %43 = tpu.matmul %40, %42, %cst_50 {dimension_numbers = #tpu.dot_dimension_numbers<[1], [0], [0], [1], [0, 0, 1, 1], [], []>} : vector<16x72xbf16>, vector<72x128xbf16>, vector<16x128xf32> -> vector<16x128xf32>
    %44 = arith.addf %38, %43 : vector<16x128xf32>
    %c0_51 = arith.constant 0 : index
    %c2_52 = arith.constant 2 : index
    %c1_53 = arith.constant 1 : index
    %c0_54 = arith.constant 0 : index
    %45 = vector.load %arg1[%c0_51, %c2_52, %c1_53, %c0_54] : memref<1x6x18x72xbf16, #tpu.memory_space<vmem>>, vector<1x1x16x72xbf16>
    %46 = vector.shape_cast %45 : vector<1x1x16x72xbf16> to vector<16x72xbf16>
    %c7 = arith.constant 7 : index
    %c0_55 = arith.constant 0 : index
    %c0_56 = arith.constant 0 : index
    %47 = vector.load %arg2[%c7, %c0_55, %c0_56] : memref<9x72x128xbf16, #tpu.memory_space<vmem>>, vector<1x72x128xbf16>
    %48 = vector.shape_cast %47 : vector<1x72x128xbf16> to vector<72x128xbf16>
    %cst_57 = arith.constant dense<0.000000e+00> : vector<16x128xf32>
    %49 = tpu.matmul %46, %48, %cst_57 {dimension_numbers = #tpu.dot_dimension_numbers<[1], [0], [0], [1], [0, 0, 1, 1], [], []>} : vector<16x72xbf16>, vector<72x128xbf16>, vector<16x128xf32> -> vector<16x128xf32>
    %50 = arith.addf %44, %49 : vector<16x128xf32>
    %c0_58 = arith.constant 0 : index
    %c2_59 = arith.constant 2 : index
    %c2_60 = arith.constant 2 : index
    %c0_61 = arith.constant 0 : index
    %51 = vector.load %arg1[%c0_58, %c2_59, %c2_60, %c0_61] : memref<1x6x18x72xbf16, #tpu.memory_space<vmem>>, vector<1x1x16x72xbf16>
    %52 = vector.shape_cast %51 : vector<1x1x16x72xbf16> to vector<16x72xbf16>
    %c8 = arith.constant 8 : index
    %c0_62 = arith.constant 0 : index
    %c0_63 = arith.constant 0 : index
    %53 = vector.load %arg2[%c8, %c0_62, %c0_63] : memref<9x72x128xbf16, #tpu.memory_space<vmem>>, vector<1x72x128xbf16>
    %54 = vector.shape_cast %53 : vector<1x72x128xbf16> to vector<72x128xbf16>
    %cst_64 = arith.constant dense<0.000000e+00> : vector<16x128xf32>
    %55 = tpu.matmul %52, %54, %cst_64 {dimension_numbers = #tpu.dot_dimension_numbers<[1], [0], [0], [1], [0, 0, 1, 1], [], []>} : vector<16x72xbf16>, vector<72x128xbf16>, vector<16x128xf32> -> vector<16x128xf32>
    %56 = arith.addf %50, %55 : vector<16x128xf32>
    %c0_65 = arith.constant 0 : index
    %c0_66 = arith.constant 0 : index
    %57 = vector.load %arg3[%c0_65, %c0_66] : memref<1x128xf32, #tpu.memory_space<vmem>>, vector<1x128xf32>
    %58 = vector.broadcast %57 : vector<1x128xf32> to vector<16x128xf32>
    %59 = arith.addf %56, %58 : vector<16x128xf32>
    %60 = arith.truncf %59 : vector<16x128xf32> to vector<16x128xbf16>
    %c0_67 = arith.constant 0 : index
    %c0_68 = arith.constant 0 : index
    %c0_69 = arith.constant 0 : index
    %c0_70 = arith.constant 0 : index
    %61 = vector.load %arg4[%c0_67, %c0_68, %c0_69, %c0_70] : memref<1x4x16x128xbf16, #tpu.memory_space<vmem>>, vector<1x1x16x128xbf16>
    %62 = vector.shape_cast %61 : vector<1x1x16x128xbf16> to vector<16x128xbf16>
    %63 = vector.shape_cast %60 : vector<16x128xbf16> to vector<1x1x16x128xbf16>
    tpu.vector_store %arg4[%c0_67, %c0_68, %c0_69, %c0_70], %63 {strides = array<i32>} : memref<1x4x16x128xbf16, #tpu.memory_space<vmem>>, vector<1x1x16x128xbf16>,
    %cst_71 = arith.constant dense<0.000000e+00> : vector<128xf32>
    %64 = vector.multi_reduction <add>, %59, %cst_71 [0] : vector<16x128xf32> to vector<128xf32>
    %65 = vector.shape_cast %64 : vector<128xf32> to vector<1x128xf32>
    %66 = arith.addf %0, %65 : vector<1x128xf32>
    %67 = arith.mulf %59, %59 : vector<16x128xf32>
    %cst_72 = arith.constant dense<0.000000e+00> : vector<128xf32>
    %68 = vector.multi_reduction <add>, %67, %cst_72 [0] : vector<16x128xf32> to vector<128xf32>
    %69 = vector.shape_cast %68 : vector<128xf32> to vector<1x128xf32>
    %70 = arith.addf %1, %69 : vector<1x128xf32>
    %cst_73 = arith.constant 0.000000e+00 : f32
    %71 = vector.broadcast %cst_73 : f32 to vector<16x128xf32>
    %c0_74 = arith.constant 0 : index
    %c1_75 = arith.constant 1 : index
    %c0_76 = arith.constant 0 : index
    %c0_77 = arith.constant 0 : index
    %72 = vector.load %arg1[%c0_74, %c1_75, %c0_76, %c0_77] : memref<1x6x18x72xbf16, #tpu.memory_space<vmem>>, vector<1x1x16x72xbf16>
    %73 = vector.shape_cast %72 : vector<1x1x16x72xbf16> to vector<16x72xbf16>
    %c0_78 = arith.constant 0 : index
    %c0_79 = arith.constant 0 : index
    %c0_80 = arith.constant 0 : index
    %74 = vector.load %arg2[%c0_78, %c0_79, %c0_80] : memref<9x72x128xbf16, #tpu.memory_space<vmem>>, vector<1x72x128xbf16>
    %75 = vector.shape_cast %74 : vector<1x72x128xbf16> to vector<72x128xbf16>
    %cst_81 = arith.constant dense<0.000000e+00> : vector<16x128xf32>
    %76 = tpu.matmul %73, %75, %cst_81 {dimension_numbers = #tpu.dot_dimension_numbers<[1], [0], [0], [1], [0, 0, 1, 1], [], []>} : vector<16x72xbf16>, vector<72x128xbf16>, vector<16x128xf32> -> vector<16x128xf32>
    %77 = arith.addf %71, %76 : vector<16x128xf32>
    %c0_82 = arith.constant 0 : index
    %c1_83 = arith.constant 1 : index
    %c1_84 = arith.constant 1 : index
    %c0_85 = arith.constant 0 : index
    %78 = vector.load %arg1[%c0_82, %c1_83, %c1_84, %c0_85] : memref<1x6x18x72xbf16, #tpu.memory_space<vmem>>, vector<1x1x16x72xbf16>
    %79 = vector.shape_cast %78 : vector<1x1x16x72xbf16> to vector<16x72xbf16>
    %c1_86 = arith.constant 1 : index
    %c0_87 = arith.constant 0 : index
    %c0_88 = arith.constant 0 : index
    %80 = vector.load %arg2[%c1_86, %c0_87, %c0_88] : memref<9x72x128xbf16, #tpu.memory_space<vmem>>, vector<1x72x128xbf16>
    %81 = vector.shape_cast %80 : vector<1x72x128xbf16> to vector<72x128xbf16>
    %cst_89 = arith.constant dense<0.000000e+00> : vector<16x128xf32>
    %82 = tpu.matmul %79, %81, %cst_89 {dimension_numbers = #tpu.dot_dimension_numbers<[1], [0], [0], [1], [0, 0, 1, 1], [], []>} : vector<16x72xbf16>, vector<72x128xbf16>, vector<16x128xf32> -> vector<16x128xf32>
    %83 = arith.addf %77, %82 : vector<16x128xf32>
    %c0_90 = arith.constant 0 : index
    %c1_91 = arith.constant 1 : index
    %c2_92 = arith.constant 2 : index
    %c0_93 = arith.constant 0 : index
    %84 = vector.load %arg1[%c0_90, %c1_91, %c2_92, %c0_93] : memref<1x6x18x72xbf16, #tpu.memory_space<vmem>>, vector<1x1x16x72xbf16>
    %85 = vector.shape_cast %84 : vector<1x1x16x72xbf16> to vector<16x72xbf16>
    %c2_94 = arith.constant 2 : index
    %c0_95 = arith.constant 0 : index
    %c0_96 = arith.constant 0 : index
    %86 = vector.load %arg2[%c2_94, %c0_95, %c0_96] : memref<9x72x128xbf16, #tpu.memory_space<vmem>>, vector<1x72x128xbf16>
    %87 = vector.shape_cast %86 : vector<1x72x128xbf16> to vector<72x128xbf16>
    %cst_97 = arith.constant dense<0.000000e+00> : vector<16x128xf32>
    %88 = tpu.matmul %85, %87, %cst_97 {dimension_numbers = #tpu.dot_dimension_numbers<[1], [0], [0], [1], [0, 0, 1, 1], [], []>} : vector<16x72xbf16>, vector<72x128xbf16>, vector<16x128xf32> -> vector<16x128xf32>
    %89 = arith.addf %83, %88 : vector<16x128xf32>
    %c0_98 = arith.constant 0 : index
    %c2_99 = arith.constant 2 : index
    %c0_100 = arith.constant 0 : index
    %c0_101 = arith.constant 0 : index
    %90 = vector.load %arg1[%c0_98, %c2_99, %c0_100, %c0_101] : memref<1x6x18x72xbf16, #tpu.memory_space<vmem>>, vector<1x1x16x72xbf16>
    %91 = vector.shape_cast %90 : vector<1x1x16x72xbf16> to vector<16x72xbf16>
    %c3_102 = arith.constant 3 : index
    %c0_103 = arith.constant 0 : index
    %c0_104 = arith.constant 0 : index
    %92 = vector.load %arg2[%c3_102, %c0_103, %c0_104] : memref<9x72x128xbf16, #tpu.memory_space<vmem>>, vector<1x72x128xbf16>
    %93 = vector.shape_cast %92 : vector<1x72x128xbf16> to vector<72x128xbf16>
    %cst_105 = arith.constant dense<0.000000e+00> : vector<16x128xf32>
    %94 = tpu.matmul %91, %93, %cst_105 {dimension_numbers = #tpu.dot_dimension_numbers<[1], [0], [0], [1], [0, 0, 1, 1], [], []>} : vector<16x72xbf16>, vector<72x128xbf16>, vector<16x128xf32> -> vector<16x128xf32>
    %95 = arith.addf %89, %94 : vector<16x128xf32>
    %c0_106 = arith.constant 0 : index
    %c2_107 = arith.constant 2 : index
    %c1_108 = arith.constant 1 : index
    %c0_109 = arith.constant 0 : index
    %96 = vector.load %arg1[%c0_106, %c2_107, %c1_108, %c0_109] : memref<1x6x18x72xbf16, #tpu.memory_space<vmem>>, vector<1x1x16x72xbf16>
    %97 = vector.shape_cast %96 : vector<1x1x16x72xbf16> to vector<16x72xbf16>
    %c4_110 = arith.constant 4 : index
    %c0_111 = arith.constant 0 : index
    %c0_112 = arith.constant 0 : index
    %98 = vector.load %arg2[%c4_110, %c0_111, %c0_112] : memref<9x72x128xbf16, #tpu.memory_space<vmem>>, vector<1x72x128xbf16>
    %99 = vector.shape_cast %98 : vector<1x72x128xbf16> to vector<72x128xbf16>
    %cst_113 = arith.constant dense<0.000000e+00> : vector<16x128xf32>
    %100 = tpu.matmul %97, %99, %cst_113 {dimension_numbers = #tpu.dot_dimension_numbers<[1], [0], [0], [1], [0, 0, 1, 1], [], []>} : vector<16x72xbf16>, vector<72x128xbf16>, vector<16x128xf32> -> vector<16x128xf32>
    %101 = arith.addf %95, %100 : vector<16x128xf32>
    %c0_114 = arith.constant 0 : index
    %c2_115 = arith.constant 2 : index
    %c2_116 = arith.constant 2 : index
    %c0_117 = arith.constant 0 : index
    %102 = vector.load %arg1[%c0_114, %c2_115, %c2_116, %c0_117] : memref<1x6x18x72xbf16, #tpu.memory_space<vmem>>, vector<1x1x16x72xbf16>
    %103 = vector.shape_cast %102 : vector<1x1x16x72xbf16> to vector<16x72xbf16>
    %c5_118 = arith.constant 5 : index
    %c0_119 = arith.constant 0 : index
    %c0_120 = arith.constant 0 : index
    %104 = vector.load %arg2[%c5_118, %c0_119, %c0_120] : memref<9x72x128xbf16, #tpu.memory_space<vmem>>, vector<1x72x128xbf16>
    %105 = vector.shape_cast %104 : vector<1x72x128xbf16> to vector<72x128xbf16>
    %cst_121 = arith.constant dense<0.000000e+00> : vector<16x128xf32>
    %106 = tpu.matmul %103, %105, %cst_121 {dimension_numbers = #tpu.dot_dimension_numbers<[1], [0], [0], [1], [0, 0, 1, 1], [], []>} : vector<16x72xbf16>, vector<72x128xbf16>, vector<16x128xf32> -> vector<16x128xf32>
    %107 = arith.addf %101, %106 : vector<16x128xf32>
    %c0_122 = arith.constant 0 : index
    %c3_123 = arith.constant 3 : index
    %c0_124 = arith.constant 0 : index
    %c0_125 = arith.constant 0 : index
    %108 = vector.load %arg1[%c0_122, %c3_123, %c0_124, %c0_125] : memref<1x6x18x72xbf16, #tpu.memory_space<vmem>>, vector<1x1x16x72xbf16>
    %109 = vector.shape_cast %108 : vector<1x1x16x72xbf16> to vector<16x72xbf16>
    %c6_126 = arith.constant 6 : index
    %c0_127 = arith.constant 0 : index
    %c0_128 = arith.constant 0 : index
    %110 = vector.load %arg2[%c6_126, %c0_127, %c0_128] : memref<9x72x128xbf16, #tpu.memory_space<vmem>>, vector<1x72x128xbf16>
    %111 = vector.shape_cast %110 : vector<1x72x128xbf16> to vector<72x128xbf16>
    %cst_129 = arith.constant dense<0.000000e+00> : vector<16x128xf32>
    %112 = tpu.matmul %109, %111, %cst_129 {dimension_numbers = #tpu.dot_dimension_numbers<[1], [0], [0], [1], [0, 0, 1, 1], [], []>} : vector<16x72xbf16>, vector<72x128xbf16>, vector<16x128xf32> -> vector<16x128xf32>
    %113 = arith.addf %107, %112 : vector<16x128xf32>
    %c0_130 = arith.constant 0 : index
    %c3_131 = arith.constant 3 : index
    %c1_132 = arith.constant 1 : index
    %c0_133 = arith.constant 0 : index
    %114 = vector.load %arg1[%c0_130, %c3_131, %c1_132, %c0_133] : memref<1x6x18x72xbf16, #tpu.memory_space<vmem>>, vector<1x1x16x72xbf16>
    %115 = vector.shape_cast %114 : vector<1x1x16x72xbf16> to vector<16x72xbf16>
    %c7_134 = arith.constant 7 : index
    %c0_135 = arith.constant 0 : index
    %c0_136 = arith.constant 0 : index
    %116 = vector.load %arg2[%c7_134, %c0_135, %c0_136] : memref<9x72x128xbf16, #tpu.memory_space<vmem>>, vector<1x72x128xbf16>
    %117 = vector.shape_cast %116 : vector<1x72x128xbf16> to vector<72x128xbf16>
    %cst_137 = arith.constant dense<0.000000e+00> : vector<16x128xf32>
    %118 = tpu.matmul %115, %117, %cst_137 {dimension_numbers = #tpu.dot_dimension_numbers<[1], [0], [0], [1], [0, 0, 1, 1], [], []>} : vector<16x72xbf16>, vector<72x128xbf16>, vector<16x128xf32> -> vector<16x128xf32>
    %119 = arith.addf %113, %118 : vector<16x128xf32>
    %c0_138 = arith.constant 0 : index
    %c3_139 = arith.constant 3 : index
    %c2_140 = arith.constant 2 : index
    %c0_141 = arith.constant 0 : index
    %120 = vector.load %arg1[%c0_138, %c3_139, %c2_140, %c0_141] : memref<1x6x18x72xbf16, #tpu.memory_space<vmem>>, vector<1x1x16x72xbf16>
    %121 = vector.shape_cast %120 : vector<1x1x16x72xbf16> to vector<16x72xbf16>
    %c8_142 = arith.constant 8 : index
    %c0_143 = arith.constant 0 : index
    %c0_144 = arith.constant 0 : index
    %122 = vector.load %arg2[%c8_142, %c0_143, %c0_144] : memref<9x72x128xbf16, #tpu.memory_space<vmem>>, vector<1x72x128xbf16>
    %123 = vector.shape_cast %122 : vector<1x72x128xbf16> to vector<72x128xbf16>
    %cst_145 = arith.constant dense<0.000000e+00> : vector<16x128xf32>
    %124 = tpu.matmul %121, %123, %cst_145 {dimension_numbers = #tpu.dot_dimension_numbers<[1], [0], [0], [1], [0, 0, 1, 1], [], []>} : vector<16x72xbf16>, vector<72x128xbf16>, vector<16x128xf32> -> vector<16x128xf32>
    %125 = arith.addf %119, %124 : vector<16x128xf32>
    %c0_146 = arith.constant 0 : index
    %c0_147 = arith.constant 0 : index
    %126 = vector.load %arg3[%c0_146, %c0_147] : memref<1x128xf32, #tpu.memory_space<vmem>>, vector<1x128xf32>
    %127 = vector.broadcast %126 : vector<1x128xf32> to vector<16x128xf32>
    %128 = arith.addf %125, %127 : vector<16x128xf32>
    %129 = arith.truncf %128 : vector<16x128xf32> to vector<16x128xbf16>
    %c0_148 = arith.constant 0 : index
    %c1_149 = arith.constant 1 : index
    %c0_150 = arith.constant 0 : index
    %c0_151 = arith.constant 0 : index
    %130 = vector.load %arg4[%c0_148, %c1_149, %c0_150, %c0_151] : memref<1x4x16x128xbf16, #tpu.memory_space<vmem>>, vector<1x1x16x128xbf16>
    %131 = vector.shape_cast %130 : vector<1x1x16x128xbf16> to vector<16x128xbf16>
    %132 = vector.shape_cast %129 : vector<16x128xbf16> to vector<1x1x16x128xbf16>
    tpu.vector_store %arg4[%c0_148, %c1_149, %c0_150, %c0_151], %132 {strides = array<i32>} : memref<1x4x16x128xbf16, #tpu.memory_space<vmem>>, vector<1x1x16x128xbf16>,
    %cst_152 = arith.constant dense<0.000000e+00> : vector<128xf32>
    %133 = vector.multi_reduction <add>, %128, %cst_152 [0] : vector<16x128xf32> to vector<128xf32>
    %134 = vector.shape_cast %133 : vector<128xf32> to vector<1x128xf32>
    %135 = arith.addf %66, %134 : vector<1x128xf32>
    %136 = arith.mulf %128, %128 : vector<16x128xf32>
    %cst_153 = arith.constant dense<0.000000e+00> : vector<128xf32>
    %137 = vector.multi_reduction <add>, %136, %cst_153 [0] : vector<16x128xf32> to vector<128xf32>
    %138 = vector.shape_cast %137 : vector<128xf32> to vector<1x128xf32>
    %139 = arith.addf %70, %138 : vector<1x128xf32>
    %cst_154 = arith.constant 0.000000e+00 : f32
    %140 = vector.broadcast %cst_154 : f32 to vector<16x128xf32>
    %c0_155 = arith.constant 0 : index
    %c2_156 = arith.constant 2 : index
    %c0_157 = arith.constant 0 : index
    %c0_158 = arith.constant 0 : index
    %141 = vector.load %arg1[%c0_155, %c2_156, %c0_157, %c0_158] : memref<1x6x18x72xbf16, #tpu.memory_space<vmem>>, vector<1x1x16x72xbf16>
    %142 = vector.shape_cast %141 : vector<1x1x16x72xbf16> to vector<16x72xbf16>
    %c0_159 = arith.constant 0 : index
    %c0_160 = arith.constant 0 : index
    %c0_161 = arith.constant 0 : index
    %143 = vector.load %arg2[%c0_159, %c0_160, %c0_161] : memref<9x72x128xbf16, #tpu.memory_space<vmem>>, vector<1x72x128xbf16>
    %144 = vector.shape_cast %143 : vector<1x72x128xbf16> to vector<72x128xbf16>
    %cst_162 = arith.constant dense<0.000000e+00> : vector<16x128xf32>
    %145 = tpu.matmul %142, %144, %cst_162 {dimension_numbers = #tpu.dot_dimension_numbers<[1], [0], [0], [1], [0, 0, 1, 1], [], []>} : vector<16x72xbf16>, vector<72x128xbf16>, vector<16x128xf32> -> vector<16x128xf32>
    %146 = arith.addf %140, %145 : vector<16x128xf32>
    %c0_163 = arith.constant 0 : index
    %c2_164 = arith.constant 2 : index
    %c1_165 = arith.constant 1 : index
    %c0_166 = arith.constant 0 : index
    %147 = vector.load %arg1[%c0_163, %c2_164, %c1_165, %c0_166] : memref<1x6x18x72xbf16, #tpu.memory_space<vmem>>, vector<1x1x16x72xbf16>
    %148 = vector.shape_cast %147 : vector<1x1x16x72xbf16> to vector<16x72xbf16>
    %c1_167 = arith.constant 1 : index
    %c0_168 = arith.constant 0 : index
    %c0_169 = arith.constant 0 : index
    %149 = vector.load %arg2[%c1_167, %c0_168, %c0_169] : memref<9x72x128xbf16, #tpu.memory_space<vmem>>, vector<1x72x128xbf16>
    %150 = vector.shape_cast %149 : vector<1x72x128xbf16> to vector<72x128xbf16>
    %cst_170 = arith.constant dense<0.000000e+00> : vector<16x128xf32>
    %151 = tpu.matmul %148, %150, %cst_170 {dimension_numbers = #tpu.dot_dimension_numbers<[1], [0], [0], [1], [0, 0, 1, 1], [], []>} : vector<16x72xbf16>, vector<72x128xbf16>, vector<16x128xf32> -> vector<16x128xf32>
    %152 = arith.addf %146, %151 : vector<16x128xf32>
    %c0_171 = arith.constant 0 : index
    %c2_172 = arith.constant 2 : index
    %c2_173 = arith.constant 2 : index
    %c0_174 = arith.constant 0 : index
    %153 = vector.load %arg1[%c0_171, %c2_172, %c2_173, %c0_174] : memref<1x6x18x72xbf16, #tpu.memory_space<vmem>>, vector<1x1x16x72xbf16>
    %154 = vector.shape_cast %153 : vector<1x1x16x72xbf16> to vector<16x72xbf16>
    %c2_175 = arith.constant 2 : index
    %c0_176 = arith.constant 0 : index
    %c0_177 = arith.constant 0 : index
    %155 = vector.load %arg2[%c2_175, %c0_176, %c0_177] : memref<9x72x128xbf16, #tpu.memory_space<vmem>>, vector<1x72x128xbf16>
    %156 = vector.shape_cast %155 : vector<1x72x128xbf16> to vector<72x128xbf16>
    %cst_178 = arith.constant dense<0.000000e+00> : vector<16x128xf32>
    %157 = tpu.matmul %154, %156, %cst_178 {dimension_numbers = #tpu.dot_dimension_numbers<[1], [0], [0], [1], [0, 0, 1, 1], [], []>} : vector<16x72xbf16>, vector<72x128xbf16>, vector<16x128xf32> -> vector<16x128xf32>
    %158 = arith.addf %152, %157 : vector<16x128xf32>
    %c0_179 = arith.constant 0 : index
    %c3_180 = arith.constant 3 : index
    %c0_181 = arith.constant 0 : index
    %c0_182 = arith.constant 0 : index
    %159 = vector.load %arg1[%c0_179, %c3_180, %c0_181, %c0_182] : memref<1x6x18x72xbf16, #tpu.memory_space<vmem>>, vector<1x1x16x72xbf16>
    %160 = vector.shape_cast %159 : vector<1x1x16x72xbf16> to vector<16x72xbf16>
    %c3_183 = arith.constant 3 : index
    %c0_184 = arith.constant 0 : index
    %c0_185 = arith.constant 0 : index
    %161 = vector.load %arg2[%c3_183, %c0_184, %c0_185] : memref<9x72x128xbf16, #tpu.memory_space<vmem>>, vector<1x72x128xbf16>
    %162 = vector.shape_cast %161 : vector<1x72x128xbf16> to vector<72x128xbf16>
    %cst_186 = arith.constant dense<0.000000e+00> : vector<16x128xf32>
    %163 = tpu.matmul %160, %162, %cst_186 {dimension_numbers = #tpu.dot_dimension_numbers<[1], [0], [0], [1], [0, 0, 1, 1], [], []>} : vector<16x72xbf16>, vector<72x128xbf16>, vector<16x128xf32> -> vector<16x128xf32>
    %164 = arith.addf %158, %163 : vector<16x128xf32>
    %c0_187 = arith.constant 0 : index
    %c3_188 = arith.constant 3 : index
    %c1_189 = arith.constant 1 : index
    %c0_190 = arith.constant 0 : index
    %165 = vector.load %arg1[%c0_187, %c3_188, %c1_189, %c0_190] : memref<1x6x18x72xbf16, #tpu.memory_space<vmem>>, vector<1x1x16x72xbf16>
    %166 = vector.shape_cast %165 : vector<1x1x16x72xbf16> to vector<16x72xbf16>
    %c4_191 = arith.constant 4 : index
    %c0_192 = arith.constant 0 : index
    %c0_193 = arith.constant 0 : index
    %167 = vector.load %arg2[%c4_191, %c0_192, %c0_193] : memref<9x72x128xbf16, #tpu.memory_space<vmem>>, vector<1x72x128xbf16>
    %168 = vector.shape_cast %167 : vector<1x72x128xbf16> to vector<72x128xbf16>
    %cst_194 = arith.constant dense<0.000000e+00> : vector<16x128xf32>
    %169 = tpu.matmul %166, %168, %cst_194 {dimension_numbers = #tpu.dot_dimension_numbers<[1], [0], [0], [1], [0, 0, 1, 1], [], []>} : vector<16x72xbf16>, vector<72x128xbf16>, vector<16x128xf32> -> vector<16x128xf32>
    %170 = arith.addf %164, %169 : vector<16x128xf32>
    %c0_195 = arith.constant 0 : index
    %c3_196 = arith.constant 3 : index
    %c2_197 = arith.constant 2 : index
    %c0_198 = arith.constant 0 : index
    %171 = vector.load %arg1[%c0_195, %c3_196, %c2_197, %c0_198] : memref<1x6x18x72xbf16, #tpu.memory_space<vmem>>, vector<1x1x16x72xbf16>
    %172 = vector.shape_cast %171 : vector<1x1x16x72xbf16> to vector<16x72xbf16>
    %c5_199 = arith.constant 5 : index
    %c0_200 = arith.constant 0 : index
    %c0_201 = arith.constant 0 : index
    %173 = vector.load %arg2[%c5_199, %c0_200, %c0_201] : memref<9x72x128xbf16, #tpu.memory_space<vmem>>, vector<1x72x128xbf16>
    %174 = vector.shape_cast %173 : vector<1x72x128xbf16> to vector<72x128xbf16>
    %cst_202 = arith.constant dense<0.000000e+00> : vector<16x128xf32>
    %175 = tpu.matmul %172, %174, %cst_202 {dimension_numbers = #tpu.dot_dimension_numbers<[1], [0], [0], [1], [0, 0, 1, 1], [], []>} : vector<16x72xbf16>, vector<72x128xbf16>, vector<16x128xf32> -> vector<16x128xf32>
    %176 = arith.addf %170, %175 : vector<16x128xf32>
    %c0_203 = arith.constant 0 : index
    %c4_204 = arith.constant 4 : index
    %c0_205 = arith.constant 0 : index
    %c0_206 = arith.constant 0 : index
    %177 = vector.load %arg1[%c0_203, %c4_204, %c0_205, %c0_206] : memref<1x6x18x72xbf16, #tpu.memory_space<vmem>>, vector<1x1x16x72xbf16>
    %178 = vector.shape_cast %177 : vector<1x1x16x72xbf16> to vector<16x72xbf16>
    %c6_207 = arith.constant 6 : index
    %c0_208 = arith.constant 0 : index
    %c0_209 = arith.constant 0 : index
    %179 = vector.load %arg2[%c6_207, %c0_208, %c0_209] : memref<9x72x128xbf16, #tpu.memory_space<vmem>>, vector<1x72x128xbf16>
    %180 = vector.shape_cast %179 : vector<1x72x128xbf16> to vector<72x128xbf16>
    %cst_210 = arith.constant dense<0.000000e+00> : vector<16x128xf32>
    %181 = tpu.matmul %178, %180, %cst_210 {dimension_numbers = #tpu.dot_dimension_numbers<[1], [0], [0], [1], [0, 0, 1, 1], [], []>} : vector<16x72xbf16>, vector<72x128xbf16>, vector<16x128xf32> -> vector<16x128xf32>
    %182 = arith.addf %176, %181 : vector<16x128xf32>
    %c0_211 = arith.constant 0 : index
    %c4_212 = arith.constant 4 : index
    %c1_213 = arith.constant 1 : index
    %c0_214 = arith.constant 0 : index
    %183 = vector.load %arg1[%c0_211, %c4_212, %c1_213, %c0_214] : memref<1x6x18x72xbf16, #tpu.memory_space<vmem>>, vector<1x1x16x72xbf16>
    %184 = vector.shape_cast %183 : vector<1x1x16x72xbf16> to vector<16x72xbf16>
    %c7_215 = arith.constant 7 : index
    %c0_216 = arith.constant 0 : index
    %c0_217 = arith.constant 0 : index
    %185 = vector.load %arg2[%c7_215, %c0_216, %c0_217] : memref<9x72x128xbf16, #tpu.memory_space<vmem>>, vector<1x72x128xbf16>
    %186 = vector.shape_cast %185 : vector<1x72x128xbf16> to vector<72x128xbf16>
    %cst_218 = arith.constant dense<0.000000e+00> : vector<16x128xf32>
    %187 = tpu.matmul %184, %186, %cst_218 {dimension_numbers = #tpu.dot_dimension_numbers<[1], [0], [0], [1], [0, 0, 1, 1], [], []>} : vector<16x72xbf16>, vector<72x128xbf16>, vector<16x128xf32> -> vector<16x128xf32>
    %188 = arith.addf %182, %187 : vector<16x128xf32>
    %c0_219 = arith.constant 0 : index
    %c4_220 = arith.constant 4 : index
    %c2_221 = arith.constant 2 : index
    %c0_222 = arith.constant 0 : index
    %189 = vector.load %arg1[%c0_219, %c4_220, %c2_221, %c0_222] : memref<1x6x18x72xbf16, #tpu.memory_space<vmem>>, vector<1x1x16x72xbf16>
    %190 = vector.shape_cast %189 : vector<1x1x16x72xbf16> to vector<16x72xbf16>
    %c8_223 = arith.constant 8 : index
    %c0_224 = arith.constant 0 : index
    %c0_225 = arith.constant 0 : index
    %191 = vector.load %arg2[%c8_223, %c0_224, %c0_225] : memref<9x72x128xbf16, #tpu.memory_space<vmem>>, vector<1x72x128xbf16>
    %192 = vector.shape_cast %191 : vector<1x72x128xbf16> to vector<72x128xbf16>
    %cst_226 = arith.constant dense<0.000000e+00> : vector<16x128xf32>
    %193 = tpu.matmul %190, %192, %cst_226 {dimension_numbers = #tpu.dot_dimension_numbers<[1], [0], [0], [1], [0, 0, 1, 1], [], []>} : vector<16x72xbf16>, vector<72x128xbf16>, vector<16x128xf32> -> vector<16x128xf32>
    %194 = arith.addf %188, %193 : vector<16x128xf32>
    %c0_227 = arith.constant 0 : index
    %c0_228 = arith.constant 0 : index
    %195 = vector.load %arg3[%c0_227, %c0_228] : memref<1x128xf32, #tpu.memory_space<vmem>>, vector<1x128xf32>
    %196 = vector.broadcast %195 : vector<1x128xf32> to vector<16x128xf32>
    %197 = arith.addf %194, %196 : vector<16x128xf32>
    %198 = arith.truncf %197 : vector<16x128xf32> to vector<16x128xbf16>
    %c0_229 = arith.constant 0 : index
    %c2_230 = arith.constant 2 : index
    %c0_231 = arith.constant 0 : index
    %c0_232 = arith.constant 0 : index
    %199 = vector.load %arg4[%c0_229, %c2_230, %c0_231, %c0_232] : memref<1x4x16x128xbf16, #tpu.memory_space<vmem>>, vector<1x1x16x128xbf16>
    %200 = vector.shape_cast %199 : vector<1x1x16x128xbf16> to vector<16x128xbf16>
    %201 = vector.shape_cast %198 : vector<16x128xbf16> to vector<1x1x16x128xbf16>
    tpu.vector_store %arg4[%c0_229, %c2_230, %c0_231, %c0_232], %201 {strides = array<i32>} : memref<1x4x16x128xbf16, #tpu.memory_space<vmem>>, vector<1x1x16x128xbf16>,
    %cst_233 = arith.constant dense<0.000000e+00> : vector<128xf32>
    %202 = vector.multi_reduction <add>, %197, %cst_233 [0] : vector<16x128xf32> to vector<128xf32>
    %203 = vector.shape_cast %202 : vector<128xf32> to vector<1x128xf32>
    %204 = arith.addf %135, %203 : vector<1x128xf32>
    %205 = arith.mulf %197, %197 : vector<16x128xf32>
    %cst_234 = arith.constant dense<0.000000e+00> : vector<128xf32>
    %206 = vector.multi_reduction <add>, %205, %cst_234 [0] : vector<16x128xf32> to vector<128xf32>
    %207 = vector.shape_cast %206 : vector<128xf32> to vector<1x128xf32>
    %208 = arith.addf %139, %207 : vector<1x128xf32>
    %cst_235 = arith.constant 0.000000e+00 : f32
    %209 = vector.broadcast %cst_235 : f32 to vector<16x128xf32>
    %c0_236 = arith.constant 0 : index
    %c3_237 = arith.constant 3 : index
    %c0_238 = arith.constant 0 : index
    %c0_239 = arith.constant 0 : index
    %210 = vector.load %arg1[%c0_236, %c3_237, %c0_238, %c0_239] : memref<1x6x18x72xbf16, #tpu.memory_space<vmem>>, vector<1x1x16x72xbf16>
    %211 = vector.shape_cast %210 : vector<1x1x16x72xbf16> to vector<16x72xbf16>
    %c0_240 = arith.constant 0 : index
    %c0_241 = arith.constant 0 : index
    %c0_242 = arith.constant 0 : index
    %212 = vector.load %arg2[%c0_240, %c0_241, %c0_242] : memref<9x72x128xbf16, #tpu.memory_space<vmem>>, vector<1x72x128xbf16>
    %213 = vector.shape_cast %212 : vector<1x72x128xbf16> to vector<72x128xbf16>
    %cst_243 = arith.constant dense<0.000000e+00> : vector<16x128xf32>
    %214 = tpu.matmul %211, %213, %cst_243 {dimension_numbers = #tpu.dot_dimension_numbers<[1], [0], [0], [1], [0, 0, 1, 1], [], []>} : vector<16x72xbf16>, vector<72x128xbf16>, vector<16x128xf32> -> vector<16x128xf32>
    %215 = arith.addf %209, %214 : vector<16x128xf32>
    %c0_244 = arith.constant 0 : index
    %c3_245 = arith.constant 3 : index
    %c1_246 = arith.constant 1 : index
    %c0_247 = arith.constant 0 : index
    %216 = vector.load %arg1[%c0_244, %c3_245, %c1_246, %c0_247] : memref<1x6x18x72xbf16, #tpu.memory_space<vmem>>, vector<1x1x16x72xbf16>
    %217 = vector.shape_cast %216 : vector<1x1x16x72xbf16> to vector<16x72xbf16>
    %c1_248 = arith.constant 1 : index
    %c0_249 = arith.constant 0 : index
    %c0_250 = arith.constant 0 : index
    %218 = vector.load %arg2[%c1_248, %c0_249, %c0_250] : memref<9x72x128xbf16, #tpu.memory_space<vmem>>, vector<1x72x128xbf16>
    %219 = vector.shape_cast %218 : vector<1x72x128xbf16> to vector<72x128xbf16>
    %cst_251 = arith.constant dense<0.000000e+00> : vector<16x128xf32>
    %220 = tpu.matmul %217, %219, %cst_251 {dimension_numbers = #tpu.dot_dimension_numbers<[1], [0], [0], [1], [0, 0, 1, 1], [], []>} : vector<16x72xbf16>, vector<72x128xbf16>, vector<16x128xf32> -> vector<16x128xf32>
    %221 = arith.addf %215, %220 : vector<16x128xf32>
    %c0_252 = arith.constant 0 : index
    %c3_253 = arith.constant 3 : index
    %c2_254 = arith.constant 2 : index
    %c0_255 = arith.constant 0 : index
    %222 = vector.load %arg1[%c0_252, %c3_253, %c2_254, %c0_255] : memref<1x6x18x72xbf16, #tpu.memory_space<vmem>>, vector<1x1x16x72xbf16>
    %223 = vector.shape_cast %222 : vector<1x1x16x72xbf16> to vector<16x72xbf16>
    %c2_256 = arith.constant 2 : index
    %c0_257 = arith.constant 0 : index
    %c0_258 = arith.constant 0 : index
    %224 = vector.load %arg2[%c2_256, %c0_257, %c0_258] : memref<9x72x128xbf16, #tpu.memory_space<vmem>>, vector<1x72x128xbf16>
    %225 = vector.shape_cast %224 : vector<1x72x128xbf16> to vector<72x128xbf16>
    %cst_259 = arith.constant dense<0.000000e+00> : vector<16x128xf32>
    %226 = tpu.matmul %223, %225, %cst_259 {dimension_numbers = #tpu.dot_dimension_numbers<[1], [0], [0], [1], [0, 0, 1, 1], [], []>} : vector<16x72xbf16>, vector<72x128xbf16>, vector<16x128xf32> -> vector<16x128xf32>
    %227 = arith.addf %221, %226 : vector<16x128xf32>
    %c0_260 = arith.constant 0 : index
    %c4_261 = arith.constant 4 : index
    %c0_262 = arith.constant 0 : index
    %c0_263 = arith.constant 0 : index
    %228 = vector.load %arg1[%c0_260, %c4_261, %c0_262, %c0_263] : memref<1x6x18x72xbf16, #tpu.memory_space<vmem>>, vector<1x1x16x72xbf16>
    %229 = vector.shape_cast %228 : vector<1x1x16x72xbf16> to vector<16x72xbf16>
    %c3_264 = arith.constant 3 : index
    %c0_265 = arith.constant 0 : index
    %c0_266 = arith.constant 0 : index
    %230 = vector.load %arg2[%c3_264, %c0_265, %c0_266] : memref<9x72x128xbf16, #tpu.memory_space<vmem>>, vector<1x72x128xbf16>
    %231 = vector.shape_cast %230 : vector<1x72x128xbf16> to vector<72x128xbf16>
    %cst_267 = arith.constant dense<0.000000e+00> : vector<16x128xf32>
    %232 = tpu.matmul %229, %231, %cst_267 {dimension_numbers = #tpu.dot_dimension_numbers<[1], [0], [0], [1], [0, 0, 1, 1], [], []>} : vector<16x72xbf16>, vector<72x128xbf16>, vector<16x128xf32> -> vector<16x128xf32>
    %233 = arith.addf %227, %232 : vector<16x128xf32>
    %c0_268 = arith.constant 0 : index
    %c4_269 = arith.constant 4 : index
    %c1_270 = arith.constant 1 : index
    %c0_271 = arith.constant 0 : index
    %234 = vector.load %arg1[%c0_268, %c4_269, %c1_270, %c0_271] : memref<1x6x18x72xbf16, #tpu.memory_space<vmem>>, vector<1x1x16x72xbf16>
    %235 = vector.shape_cast %234 : vector<1x1x16x72xbf16> to vector<16x72xbf16>
    %c4_272 = arith.constant 4 : index
    %c0_273 = arith.constant 0 : index
    %c0_274 = arith.constant 0 : index
    %236 = vector.load %arg2[%c4_272, %c0_273, %c0_274] : memref<9x72x128xbf16, #tpu.memory_space<vmem>>, vector<1x72x128xbf16>
    %237 = vector.shape_cast %236 : vector<1x72x128xbf16> to vector<72x128xbf16>
    %cst_275 = arith.constant dense<0.000000e+00> : vector<16x128xf32>
    %238 = tpu.matmul %235, %237, %cst_275 {dimension_numbers = #tpu.dot_dimension_numbers<[1], [0], [0], [1], [0, 0, 1, 1], [], []>} : vector<16x72xbf16>, vector<72x128xbf16>, vector<16x128xf32> -> vector<16x128xf32>
    %239 = arith.addf %233, %238 : vector<16x128xf32>
    %c0_276 = arith.constant 0 : index
    %c4_277 = arith.constant 4 : index
    %c2_278 = arith.constant 2 : index
    %c0_279 = arith.constant 0 : index
    %240 = vector.load %arg1[%c0_276, %c4_277, %c2_278, %c0_279] : memref<1x6x18x72xbf16, #tpu.memory_space<vmem>>, vector<1x1x16x72xbf16>
    %241 = vector.shape_cast %240 : vector<1x1x16x72xbf16> to vector<16x72xbf16>
    %c5_280 = arith.constant 5 : index
    %c0_281 = arith.constant 0 : index
    %c0_282 = arith.constant 0 : index
    %242 = vector.load %arg2[%c5_280, %c0_281, %c0_282] : memref<9x72x128xbf16, #tpu.memory_space<vmem>>, vector<1x72x128xbf16>
    %243 = vector.shape_cast %242 : vector<1x72x128xbf16> to vector<72x128xbf16>
    %cst_283 = arith.constant dense<0.000000e+00> : vector<16x128xf32>
    %244 = tpu.matmul %241, %243, %cst_283 {dimension_numbers = #tpu.dot_dimension_numbers<[1], [0], [0], [1], [0, 0, 1, 1], [], []>} : vector<16x72xbf16>, vector<72x128xbf16>, vector<16x128xf32> -> vector<16x128xf32>
    %245 = arith.addf %239, %244 : vector<16x128xf32>
    %c0_284 = arith.constant 0 : index
    %c5_285 = arith.constant 5 : index
    %c0_286 = arith.constant 0 : index
    %c0_287 = arith.constant 0 : index
    %246 = vector.load %arg1[%c0_284, %c5_285, %c0_286, %c0_287] : memref<1x6x18x72xbf16, #tpu.memory_space<vmem>>, vector<1x1x16x72xbf16>
    %247 = vector.shape_cast %246 : vector<1x1x16x72xbf16> to vector<16x72xbf16>
    %c6_288 = arith.constant 6 : index
    %c0_289 = arith.constant 0 : index
    %c0_290 = arith.constant 0 : index
    %248 = vector.load %arg2[%c6_288, %c0_289, %c0_290] : memref<9x72x128xbf16, #tpu.memory_space<vmem>>, vector<1x72x128xbf16>
    %249 = vector.shape_cast %248 : vector<1x72x128xbf16> to vector<72x128xbf16>
    %cst_291 = arith.constant dense<0.000000e+00> : vector<16x128xf32>
    %250 = tpu.matmul %247, %249, %cst_291 {dimension_numbers = #tpu.dot_dimension_numbers<[1], [0], [0], [1], [0, 0, 1, 1], [], []>} : vector<16x72xbf16>, vector<72x128xbf16>, vector<16x128xf32> -> vector<16x128xf32>
    %251 = arith.addf %245, %250 : vector<16x128xf32>
    %c0_292 = arith.constant 0 : index
    %c5_293 = arith.constant 5 : index
    %c1_294 = arith.constant 1 : index
    %c0_295 = arith.constant 0 : index
    %252 = vector.load %arg1[%c0_292, %c5_293, %c1_294, %c0_295] : memref<1x6x18x72xbf16, #tpu.memory_space<vmem>>, vector<1x1x16x72xbf16>
    %253 = vector.shape_cast %252 : vector<1x1x16x72xbf16> to vector<16x72xbf16>
    %c7_296 = arith.constant 7 : index
    %c0_297 = arith.constant 0 : index
    %c0_298 = arith.constant 0 : index
    %254 = vector.load %arg2[%c7_296, %c0_297, %c0_298] : memref<9x72x128xbf16, #tpu.memory_space<vmem>>, vector<1x72x128xbf16>
    %255 = vector.shape_cast %254 : vector<1x72x128xbf16> to vector<72x128xbf16>
    %cst_299 = arith.constant dense<0.000000e+00> : vector<16x128xf32>
    %256 = tpu.matmul %253, %255, %cst_299 {dimension_numbers = #tpu.dot_dimension_numbers<[1], [0], [0], [1], [0, 0, 1, 1], [], []>} : vector<16x72xbf16>, vector<72x128xbf16>, vector<16x128xf32> -> vector<16x128xf32>
    %257 = arith.addf %251, %256 : vector<16x128xf32>
    %c0_300 = arith.constant 0 : index
    %c5_301 = arith.constant 5 : index
    %c2_302 = arith.constant 2 : index
    %c0_303 = arith.constant 0 : index
    %258 = vector.load %arg1[%c0_300, %c5_301, %c2_302, %c0_303] : memref<1x6x18x72xbf16, #tpu.memory_space<vmem>>, vector<1x1x16x72xbf16>
    %259 = vector.shape_cast %258 : vector<1x1x16x72xbf16> to vector<16x72xbf16>
    %c8_304 = arith.constant 8 : index
    %c0_305 = arith.constant 0 : index
    %c0_306 = arith.constant 0 : index
    %260 = vector.load %arg2[%c8_304, %c0_305, %c0_306] : memref<9x72x128xbf16, #tpu.memory_space<vmem>>, vector<1x72x128xbf16>
    %261 = vector.shape_cast %260 : vector<1x72x128xbf16> to vector<72x128xbf16>
    %cst_307 = arith.constant dense<0.000000e+00> : vector<16x128xf32>
    %262 = tpu.matmul %259, %261, %cst_307 {dimension_numbers = #tpu.dot_dimension_numbers<[1], [0], [0], [1], [0, 0, 1, 1], [], []>} : vector<16x72xbf16>, vector<72x128xbf16>, vector<16x128xf32> -> vector<16x128xf32>
    %263 = arith.addf %257, %262 : vector<16x128xf32>
    %c0_308 = arith.constant 0 : index
    %c0_309 = arith.constant 0 : index
    %264 = vector.load %arg3[%c0_308, %c0_309] : memref<1x128xf32, #tpu.memory_space<vmem>>, vector<1x128xf32>
    %265 = vector.broadcast %264 : vector<1x128xf32> to vector<16x128xf32>
    %266 = arith.addf %263, %265 : vector<16x128xf32>
    %267 = arith.truncf %266 : vector<16x128xf32> to vector<16x128xbf16>
    %c0_310 = arith.constant 0 : index
    %c3_311 = arith.constant 3 : index
    %c0_312 = arith.constant 0 : index
    %c0_313 = arith.constant 0 : index
    %268 = vector.load %arg4[%c0_310, %c3_311, %c0_312, %c0_313] : memref<1x4x16x128xbf16, #tpu.memory_space<vmem>>, vector<1x1x16x128xbf16>
    %269 = vector.shape_cast %268 : vector<1x1x16x128xbf16> to vector<16x128xbf16>
    %270 = vector.shape_cast %267 : vector<16x128xbf16> to vector<1x1x16x128xbf16>
    tpu.vector_store %arg4[%c0_310, %c3_311, %c0_312, %c0_313], %270 {strides = array<i32>} : memref<1x4x16x128xbf16, #tpu.memory_space<vmem>>, vector<1x1x16x128xbf16>,
    %cst_314 = arith.constant dense<0.000000e+00> : vector<128xf32>
    %271 = vector.multi_reduction <add>, %266, %cst_314 [0] : vector<16x128xf32> to vector<128xf32>
    %272 = vector.shape_cast %271 : vector<128xf32> to vector<1x128xf32>
    %273 = arith.addf %204, %272 : vector<1x128xf32>
    %274 = arith.mulf %266, %266 : vector<16x128xf32>
    %cst_315 = arith.constant dense<0.000000e+00> : vector<128xf32>
    %275 = vector.multi_reduction <add>, %274, %cst_315 [0] : vector<16x128xf32> to vector<128xf32>
    %276 = vector.shape_cast %275 : vector<128xf32> to vector<1x128xf32>
    %277 = arith.addf %208, %276 : vector<1x128xf32>
    %c0_316 = arith.constant 0 : index
    %c0_317 = arith.constant 0 : index
    %c0_318 = arith.constant 0 : index
    %278 = vector.load %arg5[%c0_316, %c0_317, %c0_318] : memref<1x2x128xf32, #tpu.memory_space<vmem>>, vector<1x1x128xf32>
    %279 = vector.shape_cast %278 : vector<1x1x128xf32> to vector<1x128xf32>
    %280 = vector.shape_cast %273 : vector<1x128xf32> to vector<1x1x128xf32>
    tpu.vector_store %arg5[%c0_316, %c0_317, %c0_318], %280 {strides = array<i32>} : memref<1x2x128xf32, #tpu.memory_space<vmem>>, vector<1x1x128xf32>,
    %c0_319 = arith.constant 0 : index
    %c1_320 = arith.constant 1 : index
    %c0_321 = arith.constant 0 : index
    %281 = vector.load %arg5[%c0_319, %c1_320, %c0_321] : memref<1x2x128xf32, #tpu.memory_space<vmem>>, vector<1x1x128xf32>
    %282 = vector.shape_cast %281 : vector<1x1x128xf32> to vector<1x128xf32>
    %283 = vector.shape_cast %277 : vector<1x128xf32> to vector<1x1x128xf32>
    tpu.vector_store %arg5[%c0_319, %c1_320, %c0_321], %283 {strides = array<i32>} : memref<1x2x128xf32, #tpu.memory_space<vmem>>, vector<1x1x128xf32>,
    return
  }
  func.func @transform_0(%arg0: i32) -> (i32, i32, i32, i32) {
    %c0_i32 = arith.constant 0 : i32
    %c0_i32_0 = arith.constant 0 : i32
    %c0_i32_1 = arith.constant 0 : i32
    %c0_i32_2 = arith.constant 0 : i32
    return %arg0, %c0_i32, %c0_i32_0, %c0_i32_1 : i32, i32, i32, i32
  }
  func.func @transform_1(%arg0: i32) -> (i32, i32, i32) {
    %c0_i32 = arith.constant 0 : i32
    %c0_i32_0 = arith.constant 0 : i32
    %c0_i32_1 = arith.constant 0 : i32
    %c0_i32_2 = arith.constant 0 : i32
    return %c0_i32, %c0_i32_0, %c0_i32_1 : i32, i32, i32
  }
  func.func @transform_2(%arg0: i32) -> (i32, i32) {
    %c0_i32 = arith.constant 0 : i32
    %c0_i32_0 = arith.constant 0 : i32
    %c0_i32_1 = arith.constant 0 : i32
    return %c0_i32, %c0_i32_0 : i32, i32
  }
  func.func @transform_3(%arg0: i32) -> (i32, i32, i32, i32) {
    %c0_i32 = arith.constant 0 : i32
    %c0_i32_0 = arith.constant 0 : i32
    %c0_i32_1 = arith.constant 0 : i32
    %c0_i32_2 = arith.constant 0 : i32
    return %arg0, %c0_i32, %c0_i32_0, %c0_i32_1 : i32, i32, i32, i32
  }
  func.func @transform_4(%arg0: i32) -> (i32, i32, i32) {
    %c0_i32 = arith.constant 0 : i32
    %c0_i32_0 = arith.constant 0 : i32
    %c0_i32_1 = arith.constant 0 : i32
    return %arg0, %c0_i32, %c0_i32_0 : i32, i32, i32
  }
}

</mosaic_0001>

<bundles_post_ra>
// kernel: tpu_custom_call.1
= control target key start
LH: loop header
LB: loop body
LE: loop exit
PB: predicated region body
PF: predicated region fallthrough
CT: control target
= control target key end

     0   :  { %10 = vsyncpa [#allocation3], 0  ;;  %s6252_s0 = inlined_call_operand.vmem [shape: bf16[2,6,18,72], index: 0, kind: input, shape index: {}]   ;;  %s6253_s1 = inlined_call_operand.hbm [shape: bf16[9,72,128], index: 1, kind: input, shape index: {}]   ;;  %s6254_s2 = inlined_call_operand.vmem [shape: f32[1,128], index: 2, kind: input, shape index: {}]   ;;  %s6255_s3 = inlined_call_operand.hbm [shape: bf16[2,4,16,128], index: 3, kind: output, shape index: {0}]   ;;  %s6256_s4 = inlined_call_operand.hbm [shape: f32[2,2,128], index: 4, kind: output, shape index: {1}]  }
   0x1   :  { %11 = vsyncpa [#allocation4], 0 }
   0x2   :  { %13 = vsyncpa [#allocation4 + $0x1], 0 }
   0x3   :  { %14 = vsyncpa [#allocation7], 0 }
   0x4   :  { %16 = vsyncpa [#allocation7 + $0x1], 0  ;;  %s5535_s15 = smov 0   ;;  %s5537_s16 = smov 0  }
   0x5   :  { %s5539_s17 = smov 0   ;;  %s5541_s18 = smov 0  }
   0x6 LB: > { %s5556_s19 = sadd.s32 4294967295, %s5499_s18   ;;  %s3987_s20 = sadd.s32 4294967294, %s5499_s18   ;;  %s5499_s18 = sphi %s5541_s18, %s6264_s18   ;;  %s5495_s17 = sphi %s5539_s17, %s6263_s17   ;;  %s5491_s16 = sphi %s5537_s16, %s6262_s16   ;;  %s5487_s15 = sphi %s5535_s15, %s6261_s15  }
   0x7   : > { %s5560_s21 = sadd.s32 1, %s5499_s18   ;;  %s97_s22 = sadd.s32 1, %s5495_s17 }
   0x8   : > { %s94_s23 = ssub.s32 %s5499_s18, %s5560_s21  ;;  %p107_p0 = scmp.ne.s32.totalorder %s5495_s17, %s5491_s16 }
   0x9   : > { %p95_p1 = scmp.eq.s32.totalorder %s94_s23, 0  ;;  %p108_p2 = scmp.eq.s32.totalorder %s5556_s19, 1 }
   0xa   : > { %p113_p3 = scmp.ne.s32.totalorder %s5491_s16, %s5487_s15  ;;  %p114_p4 = scmp.eq.s32.totalorder %s3987_s20, 1 }
   0xb   : > { %s5571_s24 = scalar_select %p95_p1, %s5495_s17, %s97_s22  }
   0xc   : > { %p5573_p5 = por %p108_p2, %p107_p0  ;;  %p5577_p6 = por %p114_p4, %p113_p3 }
   0xd   : > { %p3988_p7 = scmp.ge.s32.totalorder %s5499_s18, 1  ;;  %p147_p8 = scmp.lt.s32.totalorder %s5499_s18, 3 }
   0xe   : > { %s6258_s26 = scalar_select %p5577_p6, 1, 0 }
   0xf   : > { %p5113_p9 = scmp.eq.s32.totalorder %s5556_s19, 0  ;;  %p5584_p10 = pnand %p3988_p7, %p147_p8 }
  0x10   : > { %s5501_s28 = smov [#allocation2]  }
  0x11   : > { %s159_s29 = sshll.u32 %s5501_s28, 4  ;;  %p5102_p11 = pneg %p5584_p10  ;;  %s160_s29 = int_to_ptr.vmem [resolvable:$true] %s159_s29 }
  0x12   : > { %s5390_s30 = scalar_lea.vmem %s160_s29, 5184  ;;  %p5398_p3 = scmp.lt.s32.totalorder %s160_s29, %s160_s29 }
  0x13   : > { %p5103_p12 = pnand %p5113_p9, %p5102_p11  ;;  %p5391_p0 = scmp.ne.s32.totalorder %s160_s29, %s5390_s30 }
  0x14   : > { %p5399_p4 = scmp.lt.s32.totalorder %s5390_s30, %s5390_s30 }
  0x15   : > { %p5381_p13 = pneg %p5103_p12 }
  0x16   : > { %p5400_p6 = por %p5399_p4, %p5398_p3 }
  0x17   : > { %p5393_p1 = pnand %p5391_p0, %p5381_p13 }
  0x19   : > { %p5394_p2 = pneg %p5393_p1 }
  0x1b   : > { %p5401_p7 = pnand %p5400_p6, %p5394_p2 }
  0x1d   : > { %5404 = shalt.err (!%p5401_p7)
}
  0x1e   : > { %s5502_s5 = smov 64   ;;  %s5503_s6 = smov 4  }
  0x1f   : > { %5105 = dma.hbm_to_vmem [thread:$0]  (!%p5103_p12), %s6253_s1, 5184, %s160_s29, [#allocation3], %s5502_s5, %s5502_s5, %s5503_s6  }
  0x20   : > { %186 = sbr.rel (%p5584_p10) target bundleno = 644 (0x284), region = 32 }
  0x25   : > { %5474 = dma.done.wait (%p5113_p9), [#allocation3], 5184  }
  0x26   : > { %5476 = vsyncadd (%p5113_p9), [#allocation3], 4294962112  ;;  %v5504_v0 = vmov 0.0   ;;  %p217_p6 = scmp.lt.s32.totalorder %s5556_s19, 1  ;;  %vm5505_vm0 = vmmov 0   ;;  %vm297_vm1 = vcmask 1043456  }
  0x27   : > { %4589 = vmatprep.subr.bf16.mxu0 %v5504_v0  ;;  %4603 = vmatprep.subr.bf16.mxu1 %v5504_v0  ;;  %v5155_v1 = vld [vmem:[#allocation2 + $0x44] ss:$0 sps:$4 sm:$0xff]   ;;  %v5156_v2 = vld [vmem:[#allocation2 + $0x20] ss:$0 sps:$4 sm:$0xff]   ;;  %v5158_v6 = vld [vmem:[#allocation2 + $0x18] sm:$0xff]   ;;  %vm293_vm3 = vcmask 588800  }
  0x28   : > { %4599 = vmatprep.mubr.msk.bf16.mxu0 %vm5505_vm0, %v5504_v0  ;;  %4613 = vmatprep.mubr.msk.bf16.mxu1 %vm5505_vm0, %v5504_v0  ;;  %s218_s9 = scalar_select %p217_p6, %s5556_s19, 1  ;;  %v299_v3 = vsel %vm297_vm1, %v5155_v1, 0  ;;  %v372_v4 = vsel %vm297_vm1, %v5156_v2, 0  ;;  %v5157_v5 = vld [vmem:[#allocation2 + $0x3c] sm:$0xff]   ;;  %v5159_v7 = vld [vmem:[#allocation2 + $0x34] sm:$0xff]   ;;  %v5161_v13 = vld [vmem:[#allocation2 + $0x2c] sm:$0xff]  }
  0x29   : > { %4590 = vmatpush3.bf16.msra.mxu0 %v299_v3  ;;  %4604 = vmatpush3.bf16.msra.mxu1 %v372_v4  ;;  %v5160_v8 = vld [vmem:[#allocation2 + $0x10] sm:$0xff]   ;;  %v5162_v14 = vld [vmem:[#allocation2 + $0x8] sm:$0xff]   ;;  %vm253_vm2 = vsmask.f32 7424  ;;  %v5164_v19 = vld [vmem:[#allocation2] sm:$0xff]   ;;  %vm429_vm4 = vcmask 1046528  }
  0x2a   : > { %s5093_s10 = smul.u32 72, %s218_s9  ;;  %4591 = vmatprep.subr.bf16.mxu0 %v5504_v0  ;;  %4605 = vmatprep.subr.bf16.mxu1 %v5504_v0  ;;  %v5163_v18 = vld [vmem:[#allocation2 + $0x24] sm:$0xff]   ;;  %v5168_v24 = vld [vmem:[#allocation2 + $0x8c] ss:$0 sps:$4 sm:$0xff]   ;;  %v5171_v30 = vld [vmem:[#allocation2 + $0x58] sm:$0xff]   ;;  %s6037_s22 = sand.u32 1, %s5491_s16  }
  0x2b   : > { %v5167_v22 = vld [vmem:[#allocation2 + $0x68] ss:$0 sps:$4 sm:$0xff]   ;;  %v558_v27 = vsel %vm297_vm1, %v5168_v24, 0  ;;  %v5169_v28 = vld [vmem:[#allocation2 + $0x60] sm:$0xff]   ;;  %v5173_v33 = vld [vmem:[#allocation2 + $0x50] sm:$0xff]   ;;  %s3993_s23 = sshll.u32 %s6037_s22, 5 }
  0x2c   : > { %s5616_s13 = scalar_lea.vmem %s6252_s0, %s5093_s10  ;;  %v464_v26 = vsel %vm297_vm1, %v5167_v22, 0  ;;  %v5170_v29 = vld [vmem:[#allocation2 + $0x84] sm:$0xff]   ;;  %v5172_v31 = vld [vmem:[#allocation2 + $0x7c] sm:$0xff]   ;;  %v5174_v35 = vld [vmem:[#allocation2 + $0x74] sm:$0xff]   ;;  %s6063_s27 = scalar_lea.vmem [#allocation5], %s3993_s23 }
  0x2d   : > { %4592 = vmatpush3.bf16.msra.mxu0 %v5157_v5  ;;  %4606 = vmatpush3.bf16.msra.mxu1 %v5158_v6  ;;  %v223_v9 = vld [vmem:[%s5616_s13] sm:$0xf]  ;;  %v224_v10 = vld [vmem:[%s5616_s13 + $0x4] sm:$0xf]  ;;  %v5175_v36 = vld [vmem:[#allocation2 + $0x48] sm:$0xff]   ;;  %s3868_s28 = sshll.u32 %s6063_s27, 4  ;;  %s6183_s28 = int_to_ptr.vmem [resolvable:$true] %s3868_s28 }
  0x2e   : > { %4593 = vmatprep.subr.bf16.mxu0 %v5504_v0  ;;  %4607 = vmatprep.subr.bf16.mxu1 %v5504_v0  ;;  %v3996_v11 = vcombine.low %v223_v9, %v224_v10  ;;  %v5623_v12 = vld [vmem:[%s5616_s13 + $0x8] ss:$0 sps:$4 sm:$0x11]   ;;  %v415_v32 = vld [vmem:[%s5616_s13] sm:$0xe]  ;;  %v5176_v38 = vld [vmem:[#allocation2 + $0x6c] sm:$0xff]  }
  0x2f   : > { %v262_v17 = vshll.u32 %v5623_v12, 16  ;;  %v4010_v34 = vcombine.low %v415_v32, %v224_v10  ;;  %v431_v37 = vrot.slane %v5623_v12, 1  ;;  %v5179_v40 = vld [vmem:[#allocation2 + $0xb0] ss:$0 sps:$4 sm:$0xff]   ;;  %v5180_v41 = vld [vmem:[#allocation2 + $0xd4] ss:$0 sps:$4 sm:$0xff]  }
  0x30   : > { %v255_v15 = vshrl.u32 %v3996_v11, 16  ;;  %v257_v16 = vshll.u32 %v3996_v11, 16  ;;  %v4026_v42 = vld [vmem:[%s5616_s13 + $0xc] sm:$0xf]  ;;  %v4027_v44 = vld [vmem:[%s5616_s13 + $0x10] sm:$0xf] }
  0x31   : > { %4594 = vmatpush3.bf16.msra.mxu0 %v5159_v7  ;;  %4608 = vmatpush3.bf16.msra.mxu1 %v5160_v8  ;;  %v264_v21 = vrot.slane %v262_v17, 1  ;;  %v430_v39 = vrot.slane %v4010_v34, 1  ;;  %v5178_v43 = vld [vmem:[%s5616_s13 + $0xc] sm:$0xff]   ;;  %v667_v46 = vsel %vm297_vm1, %v5179_v40, 0  ;;  %v760_v47 = vsel %vm297_vm1, %v5180_v41, 0  ;;  %v5183_v53 = vld [vmem:[#allocation2 + $0xa0] sm:$0xff]  }
  0x32   : > { %4595 = vmatprep.subr.bf16.mxu0 %v5504_v0  ;;  %4609 = vmatprep.subr.bf16.mxu1 %v5504_v0  ;;  %v259_v20 = vrot.slane %v257_v16, 1  ;;  %v4029_v48 = vcombine.low %v4026_v42, %v4027_v44  ;;  %v5181_v49 = vld [vmem:[#allocation2 + $0xa8] sm:$0xff]   ;;  %v5190_v51 = vld [vmem:[%s5616_s13 + $0x14] ss:$0 sps:$4 sm:$0x11]   ;;  %v5185_v56 = vld [vmem:[#allocation2 + $0x98] sm:$0xff]  }
  0x33   : > { %v432_v45 = vsel %vm429_vm4, %v430_v39, %v431_v37  ;;  %v5182_v50 = vld [vmem:[#allocation2 + $0xcc] sm:$0xff]   ;;  %v5184_v54 = vld [vmem:[#allocation2 + $0xc4] sm:$0xff]   ;;  %v632_v59 = vshll.u32 %v5190_v51, 16  ;;  %v5186_v60 = vld [vmem:[#allocation2 + $0xbc] sm:$0xff]   ;;  %v727_v5 = vrot.slane %v5190_v51, 1  ;;  %s4349_s29 = sshll.u32 %s5556_s19, 9 }
  0x34   : > { %v260_v23 = vor.u32 %v259_v20, %v255_v15  ;;  %v627_v52 = vshll.u32 %v4029_v48, 16  ;;  %v4037_v55 = vld [vmem:[%s5616_s13 + $0xc] sm:$0xe]  ;;  %v625_v57 = vshrl.u32 %v4029_v48, 16  ;;  %v5187_v62 = vld [vmem:[#allocation2 + $0x90] sm:$0xff]   ;;  %v5198_v20 = vld [vmem:[#allocation2 + $0xe0] sm:$0xff]   ;;  %s6189_s6 = scalar_lea.hbm %s6255_s3, %s4349_s29 }
  0x35   : > { %4596 = vmatpush3.bf16.msra.mxu0 %v5161_v13  ;;  %4610 = vmatpush3.bf16.msra.mxu1 %v5162_v14  ;;  %v4038_v61 = vcombine.low %v4037_v55, %v4027_v44  ;;  %v5188_v63 = vld [vmem:[#allocation2 + $0xb4] sm:$0xff]   ;;  %v634_v2 = vrot.slane %v632_v59, 1  ;;  %v5193_v6 = vld [vmem:[#allocation2 + $0x11c] ss:$0 sps:$4 sm:$0xff]   ;;  %v5196_v16 = vld [vmem:[#allocation2 + $0xe8] sm:$0xff]   ;;  %s3850_s7 = scalar_lea.sflag [#allocation4], %s6037_s22 }
  0x36   : > { %4597 = vmatprep.subr.bf16.mxu0 %v5504_v0  ;;  %4611 = vmatprep.subr.bf16.mxu1 %v5504_v0  ;;  %v265_v25 = vsel %vm253_vm2, %v260_v23, %v264_v21  ;;  %v629_v58 = vrot.slane %v627_v52, 1  ;;  %v5192_v3 = vld [vmem:[#allocation2 + $0xf8] ss:$0 sps:$4 sm:$0xff]   ;;  %v963_v10 = vsel %vm297_vm1, %v5193_v6, 0  ;;  %v5683_v13 = vld [vmem:[%s5616_s13 + $0x1c] sm:$0xf] }
  0x37   : > { %v726_v4 = vrot.slane %v4038_v61, 1  ;;  %v854_v9 = vsel %vm297_vm1, %v5192_v3, 0  ;;  %v4054_v12 = vld [vmem:[%s5616_s13 + $0x18] sm:$0xf]  ;;  %v5197_v17 = vld [vmem:[#allocation2 + $0x10c] sm:$0xff]   ;;  %v5199_v21 = vld [vmem:[#allocation2 + $0x104] sm:$0xff]  }
  0x38   : > { %v630_v1 = vor.u32 %v629_v58, %v625_v57  ;;  %v5195_v14 = vld [vmem:[#allocation2 + $0x114] sm:$0xff]   ;;  %v4057_v15 = vcombine.low %v4054_v12, %v5683_v13  ;;  %v5212_v48 = vld [vmem:[#allocation2 + $0x2c] sm:$0xff]   ;;  %v5213_v52 = vld [vmem:[#allocation2 + $0x120] sm:$0xff]   ;;  %s5405_s8 = scalar_lea.vmem %s6183_s28, 512  ;;  %s5506_s9 = smov [#allocation5]  }
  0x39   : > { %4598 = vmatpush3.bf16.msra.mxu0 %v5163_v18  ;;  %4612 = vmatpush3.bf16.msra.mxu1 %v5164_v19  ;;  %v728_v8 = vsel %vm429_vm4, %v726_v4, %v727_v5  ;;  %v5696_v18 = vld [vmem:[%s5616_s13 + $0x20] ss:$0 sps:$4 sm:$0x11]   ;;  %v5207_v37 = vld [vmem:[#allocation2 + $0x138] sm:$0xff]   ;;  %v5209_v42 = vld [vmem:[#allocation2 + $0x130] sm:$0xff]   ;;  %p5406_p8 = scmp.ne.s32.totalorder %s6183_s28, %s5405_s8  ;;  %s5409_s10 = sshll.u32 %s5506_s9, 4  ;;  %s5410_s10 = int_to_ptr.vmem [resolvable:$false] %s5409_s10 }
  0x3a   : > { %4617 = vmatprep.subr.bf16.mxu0 %v5504_v0  ;;  %4631 = vmatprep.subr.bf16.mxu1 %v5504_v0  ;;  %v635_v7 = vsel %vm253_vm2, %v630_v1, %v634_v2  ;;  %v923_v19 = vshll.u32 %v4057_v15, 16  ;;  %v921_v22 = vshrl.u32 %v4057_v15, 16  ;;  %v928_v24 = vshll.u32 %v5696_v18, 16  ;;  %v4065_v40 = vld [vmem:[%s5616_s13 + $0x18] sm:$0xe]  ;;  %v5214_v55 = vld [vmem:[#allocation2 + $0x24] sm:$0xff]   ;;  %p5412_p11 = scmp.lt.s32.totalorder %s6183_s28, %s5410_s10 }
  0x3b   : > { %v5727_v41 = vld [vmem:[%s5616_s13 + $0x14] ss:$0 sps:$4 sm:$0x11]   ;;  %v5219_v58 = vld [vmem:[#allocation2 + $0x68] ss:$0 sps:$4 sm:$0xff]   ;;  %v5221_v1 = vld [vmem:[#allocation2 + $0x60] sm:$0xff]   ;;  %p5407_p9 = pnand %p5406_p8, %p5573_p5 }
  0x3c   : > { %4600 = vmatmul.mubr.msk.bf16.vlgmr.msra.gmra.mxu0 %vm293_vm3, %v265_v25  ;;  %4614 = vmatmul.mubr.msk.bf16.vlgmr.msra.gmra.mxu1 %vm293_vm3, %v3996_v11  ;;  %v5194_v11 = vld [vmem:[#allocation2 + $0xf0] sm:$0xff]   ;;  %v925_v23 = vrot.slane %v923_v19, 1  ;;  %v5200_v25 = vld [vmem:[#allocation2 + $0xd8] sm:$0xff]   ;;  %v1175_v51 = vshll.u32 %v5727_v41, 16  ;;  %v4093_v4 = vld [vmem:[%s5616_s13 + $0xc] sm:$0xe] }
  0x3d   : > { %4618 = vmatpush3.bf16.msra.mxu0 %v464_v26  ;;  %4632 = vmatpush3.bf16.msra.mxu1 %v558_v27  ;;  %v5205_v26 = vld [vmem:[#allocation2 + $0x140] ss:$0 sps:$4 sm:$0xff]   ;;  %v5222_v2 = vld [vmem:[#allocation2 + $0x10] sm:$0xff]   ;;  %v5223_v3 = vld [vmem:[#allocation2 + $0x58] sm:$0xff]   ;;  %p5408_p10 = pneg %p5407_p9  ;;  %s5411_s11 = scalar_lea.vmem %s5410_s10, 1024 }
  0x3e   : > { %4619 = vmatprep.subr.bf16.mxu0 %v5504_v0  ;;  %4633 = vmatprep.subr.bf16.mxu1 %v5504_v0  ;;  %v5201_v27 = vld [vmem:[#allocation2 + $0xfc] sm:$0xff]   ;;  %v1177_v57 = vrot.slane %v1175_v51, 1  ;;  %v5224_v5 = vld [vmem:[#allocation2 + $0x8] sm:$0xff]   ;;  %v5225_v6 = vld [vmem:[#allocation2 + $0x50] sm:$0xff]   ;;  %p5413_p12 = scmp.lt.s32.totalorder %s5411_s11, %s5405_s8 }
  0x3f   : > { %4627 = vmatprep.mubr.msk.bf16.mxu0 %vm5505_vm0, %v5504_v0  ;;  %4641 = vmatprep.mubr.msk.bf16.mxu1 %vm5505_vm0, %v5504_v0  ;;  %v5227_v12 = vld [vmem:[#allocation2 + $0x48] sm:$0xff]   ;;  %v5250_v51 = vld [vmem:[#allocation2 + $0xb4] sm:$0xff]  }
  0x40   : > { %v5231_v19 = vld [vmem:[#allocation2 + $0x84] sm:$0xff]   ;;  %p5414_p13 = por %p5413_p12, %p5412_p11 }
  0x41   : > { %4620 = vmatpush3.bf16.msra.mxu0 %v5169_v28  ;;  %4634 = vmatpush3.bf16.msra.mxu1 %v5170_v29  ;;  %v926_v28 = vor.u32 %v925_v23, %v921_v22  ;;  %v930_v29 = vrot.slane %v928_v24, 1  ;;  %v5783_v22 = vld [vmem:[%s5616_s13 + $0x20] ss:$0 sps:$4 sm:$0x11]  }
  0x42   : > { %4621 = vmatprep.subr.bf16.mxu0 %v5504_v0  ;;  %4635 = vmatprep.subr.bf16.mxu1 %v5504_v0  ;;  %v5233_v23 = vld [vmem:[#allocation2 + $0x7c] sm:$0xff]   ;;  %p5415_p0 = pnand %p5414_p13, %p5408_p10 }
  0x43   : > { %v931_v32 = vsel %vm253_vm2, %v926_v28, %v930_v29  ;;  %v5234_v24 = vld [vmem:[#allocation2 + $0xa0] sm:$0xff]  }
  0x45   : > { %4622 = vmatpush3.bf16.msra.mxu0 %v5171_v30  ;;  %4636 = vmatpush3.bf16.msra.mxu1 %v5172_v31  ;;  %v5206_v30 = vld [vmem:[#allocation2 + $0x44] ss:$0 sps:$4 sm:$0xff]   ;;  %v5202_v31 = vld [vmem:[%s5616_s13 + $0x18] sm:$0xff]  }
  0x46   : > { %4623 = vmatprep.subr.bf16.mxu0 %v5504_v0  ;;  %4637 = vmatprep.subr.bf16.mxu1 %v5504_v0  ;;  %v1210_v34 = vsel %vm297_vm1, %v5206_v30, 0  ;;  %v1538_v30 = vshll.u32 %v5783_v22, 16 }
  0x49   : > { %4624 = vmatpush3.bf16.msra.mxu0 %v5173_v33  ;;  %4638 = vmatpush3.bf16.msra.mxu1 %v5174_v35  ;;  %v1056_v33 = vsel %vm297_vm1, %v5205_v26, 0  ;;  %v4076_v35 = vld [vmem:[%s5616_s13 + $0xc] sm:$0xf]  ;;  %v5235_v26 = vld [vmem:[#allocation2 + $0x74] sm:$0xff]  }
  0x4a   : > { %4625 = vmatprep.subr.bf16.mxu0 %v5504_v0  ;;  %4639 = vmatprep.subr.bf16.mxu1 %v5504_v0 }
  0x4d   : > { %4626 = vmatpush3.bf16.msra.mxu0 %v5175_v36  ;;  %4640 = vmatpush3.bf16.msra.mxu1 %v5176_v38  ;;  %v5712_v36 = vld [vmem:[%s5616_s13 + $0x10] sm:$0xf]  ;;  %v5208_v38 = vld [vmem:[#allocation2 + $0x3c] sm:$0xff]  }
  0x4e   : > { %4645 = vmatprep.subr.bf16.mxu0 %v5504_v0  ;;  %4659 = vmatprep.subr.bf16.mxu1 %v5504_v0  ;;  %v5718_v39 = vcombine.low %v4076_v35, %v5712_v36  ;;  %v1540_v35 = vrot.slane %v1538_v30, 1  ;;  %v5859_v30 = vld [vmem:[%s5616_s13 + $0x20] ss:$0 sps:$4 sm:$0x11]  }
  0x50   : > { %4628 = vmatmul.mubr.msk.bf16.vlgmr.msra.gmra.mxu0 %vm293_vm3, %v432_v45  ;;  %4642 = vmatmul.mubr.msk.bf16.vlgmr.msra.gmra.mxu1 %vm293_vm3, %v5178_v43  ;;  %v5210_v43 = vld [vmem:[#allocation2 + $0x34] sm:$0xff]   ;;  %v1170_v44 = vshll.u32 %v5718_v39, 16  ;;  %v4066_v45 = vcombine.low %v4065_v40, %v5683_v13 }
  0x51   : > { %4646 = vmatpush3.bf16.msra.mxu0 %v667_v46  ;;  %4660 = vmatpush3.bf16.msra.mxu1 %v760_v47  ;;  %v5211_v46 = vld [vmem:[#allocation2 + $0x128] sm:$0xff]   ;;  %v1023_v47 = vrot.slane %v5696_v18, 1  ;;  %v5770_v18 = vld [vmem:[%s5616_s13 + $0x1c] sm:$0xf] }
  0x52   : > { %4647 = vmatprep.subr.bf16.mxu0 %v5504_v0  ;;  %4661 = vmatprep.subr.bf16.mxu1 %v5504_v0 }
  0x53   : > { %4655 = vmatprep.mubr.msk.bf16.mxu0 %vm5505_vm0, %v5504_v0  ;;  %4669 = vmatprep.mubr.msk.bf16.mxu1 %vm5505_vm0, %v5504_v0 }
  0x55   : > { %4648 = vmatpush3.bf16.msra.mxu0 %v5181_v49  ;;  %4662 = vmatpush3.bf16.msra.mxu1 %v5182_v50  ;;  %v1168_v49 = vshrl.u32 %v5718_v39, 16  ;;  %v1172_v50 = vrot.slane %v1170_v44, 1  ;;  %v5247_v44 = vld [vmem:[#allocation2 + $0xe8] sm:$0xff]  }
  0x56   : > { %4649 = vmatprep.subr.bf16.mxu0 %v5504_v0  ;;  %4663 = vmatprep.subr.bf16.mxu1 %v5504_v0 }
  0x59   : > { %4650 = vmatpush3.bf16.msra.mxu0 %v5183_v53  ;;  %4664 = vmatpush3.bf16.msra.mxu1 %v5184_v54  ;;  %v1022_v53 = vrot.slane %v4066_v45, 1  ;;  %v5218_v54 = vld [vmem:[#allocation2 + $0x20] ss:$0 sps:$4 sm:$0xff]   ;;  %v4121_v45 = vld [vmem:[%s5616_s13 + $0x18] sm:$0xe] }
  0x5a   : > { %4651 = vmatprep.subr.bf16.mxu0 %v5504_v0  ;;  %4665 = vmatprep.subr.bf16.mxu1 %v5504_v0  ;;  %v1283_v61 = vsel %vm297_vm1, %v5218_v54, 0  ;;  %v5255_v54 = vld [vmem:[#allocation2 + $0x140] ss:$0 sps:$4 sm:$0xff]  }
  0x5b   : > { %v1024_v59 = vsel %vm429_vm4, %v1022_v53, %v1023_v47  ;;  %v4122_v47 = vcombine.low %v4121_v45, %v5770_v18  ;;  %v5251_v53 = vld [vmem:[#allocation2 + $0xd8] sm:$0xff]  }
  0x5d   : > { %4652 = vmatpush3.bf16.msra.mxu0 %v5185_v56  ;;  %4666 = vmatpush3.bf16.msra.mxu1 %v5186_v60  ;;  %v1173_v56 = vor.u32 %v1172_v50, %v1168_v49  ;;  %v1632_v49 = vrot.slane %v5783_v22, 1  ;;  %v5254_v50 = vld [vmem:[#allocation2 + $0x11c] ss:$0 sps:$4 sm:$0xff]   ;;  %v4162_v22 = vld [vmem:[%s5616_s13 + $0x18] sm:$0xf] }
  0x5e   : > { %4653 = vmatprep.subr.bf16.mxu0 %v5504_v0  ;;  %4667 = vmatprep.subr.bf16.mxu1 %v5504_v0 }
  0x5f   : > { %v1178_v60 = vsel %vm253_vm2, %v1173_v56, %v1177_v57  ;;  %v5253_v56 = vld [vmem:[%s5616_s13 + $0x24] sm:$0xff]   ;;  %v1866_v57 = vsel %vm297_vm1, %v5254_v50, 0  ;;  %v5284_v50 = vld [vmem:[#allocation2 + $0x7c] sm:$0xff]  }
  0x61   : > { %4654 = vmatpush3.bf16.msra.mxu0 %v5187_v62  ;;  %4668 = vmatpush3.bf16.msra.mxu1 %v5188_v63  ;;  %v1373_v62 = vsel %vm297_vm1, %v5219_v58, 0  ;;  %v5220_v63 = vld [vmem:[#allocation2 + $0x18] sm:$0xff]   ;;  %v4138_v58 = vld [vmem:[%s5616_s13 + $0x24] sm:$0xf] }
  0x62   : > { %4673 = vmatprep.subr.bf16.mxu0 %v5504_v0  ;;  %4687 = vmatprep.subr.bf16.mxu1 %v5504_v0 }
  0x64   : > { %4656 = vmatmul.mubr.msk.bf16.vlgmr.msra.gmra.mxu0 %vm293_vm3, %v635_v7  ;;  %4670 = vmatmul.mubr.msk.bf16.vlgmr.msra.gmra.mxu1 %vm293_vm3, %v728_v8  ;;  %v4094_v7 = vcombine.low %v4093_v4, %v5712_v36  ;;  %v5229_v8 = vld [vmem:[#allocation2 + $0x8c] ss:$0 sps:$4 sm:$0xff]   ;;  %v5243_v36 = vld [vmem:[#allocation2 + $0xf8] ss:$0 sps:$4 sm:$0xff]  }
  0x65   : > { %4674 = vmatpush3.bf16.msra.mxu0 %v854_v9  ;;  %4688 = vmatpush3.bf16.msra.mxu1 %v963_v10  ;;  %v5230_v9 = vld [vmem:[#allocation2 + $0xb0] ss:$0 sps:$4 sm:$0xff]   ;;  %v5226_v10 = vld [vmem:[#allocation2] sm:$0xff]   ;;  %v1758_v40 = vsel %vm297_vm1, %v5243_v36, 0  ;;  %v2078_v36 = vshll.u32 %v5859_v30, 16 }
  0x66   : > { %4675 = vmatprep.subr.bf16.mxu0 %v5504_v0  ;;  %4689 = vmatprep.subr.bf16.mxu1 %v5504_v0  ;;  %v1339_v13 = vrot.slane %v4094_v7, 1  ;;  %v1573_v15 = vsel %vm297_vm1, %v5230_v9, 0 }
  0x67   : > { %4683 = vmatprep.mubr.msk.bf16.mxu0 %vm5505_vm0, %v5504_v0  ;;  %4697 = vmatprep.mubr.msk.bf16.mxu1 %vm5505_vm0, %v5504_v0 }
  0x69   : > { %4676 = vmatpush3.bf16.msra.mxu0 %v5194_v11  ;;  %4690 = vmatpush3.bf16.msra.mxu1 %v5195_v14  ;;  %v1340_v11 = vrot.slane %v5727_v41, 1  ;;  %v1465_v14 = vsel %vm297_vm1, %v5229_v8, 0  ;;  %v5244_v41 = vld [vmem:[#allocation2 + $0xcc] sm:$0xff]   ;;  %v5267_v8 = vld [vmem:[#allocation2 + $0x44] ss:$0 sps:$4 sm:$0xff]  }
  0x6a   : > { %4677 = vmatprep.subr.bf16.mxu0 %v5504_v0  ;;  %4691 = vmatprep.subr.bf16.mxu1 %v5504_v0 }
  0x6d   : > { %4678 = vmatpush3.bf16.msra.mxu0 %v5196_v16  ;;  %4692 = vmatpush3.bf16.msra.mxu1 %v5197_v17  ;;  %v1341_v16 = vsel %vm429_vm4, %v1339_v13, %v1340_v11  ;;  %v4110_v17 = vld [vmem:[%s5616_s13 + $0x18] sm:$0xf]  ;;  %v5261_v13 = vld [vmem:[#allocation2 + $0x128] sm:$0xff]  }
  0x6e   : > { %4679 = vmatprep.subr.bf16.mxu0 %v5504_v0  ;;  %4693 = vmatprep.subr.bf16.mxu1 %v5504_v0 }
  0x71   : > { %4680 = vmatpush3.bf16.msra.mxu0 %v5198_v20  ;;  %4694 = vmatpush3.bf16.msra.mxu1 %v5199_v21  ;;  %v5232_v20 = vld [vmem:[#allocation2 + $0xa8] sm:$0xff]   ;;  %v4113_v21 = vcombine.low %v4110_v17, %v5770_v18  ;;  %v2113_v18 = vsel %vm297_vm1, %v5267_v8, 0 }
  0x72   : > { %4681 = vmatprep.subr.bf16.mxu0 %v5504_v0  ;;  %4695 = vmatprep.subr.bf16.mxu1 %v5504_v0 }
  0x73   : > { %v1531_v28 = vshrl.u32 %v4113_v21, 16 }
  0x75   : > { %4682 = vmatpush3.bf16.msra.mxu0 %v5200_v25  ;;  %4696 = vmatpush3.bf16.msra.mxu1 %v5201_v27  ;;  %v1533_v25 = vshll.u32 %v4113_v21, 16  ;;  %v5236_v27 = vld [vmem:[#allocation2 + $0x98] sm:$0xff]  }
  0x76   : > { %4701 = vmatprep.subr.bf16.mxu0 %v5504_v0  ;;  %4715 = vmatprep.subr.bf16.mxu1 %v5504_v0 }
  0x77   : > { %v1535_v29 = vrot.slane %v1533_v25, 1 }
  0x78   : > { %4684 = vmatmul.mubr.msk.bf16.vlgmr.msra.gmra.mxu0 %vm293_vm3, %v5202_v31  ;;  %4698 = vmatmul.mubr.msk.bf16.vlgmr.msra.gmra.mxu1 %vm293_vm3, %v931_v32  ;;  %v5237_v31 = vld [vmem:[#allocation2 + $0x6c] sm:$0xff]   ;;  %v5242_v32 = vld [vmem:[#allocation2 + $0xd4] ss:$0 sps:$4 sm:$0xff]  }
  0x79   : > { %4702 = vmatpush3.bf16.msra.mxu0 %v1056_v33  ;;  %4716 = vmatpush3.bf16.msra.mxu1 %v1210_v34  ;;  %v5238_v33 = vld [vmem:[#allocation2 + $0x90] sm:$0xff]   ;;  %v1536_v34 = vor.u32 %v1535_v29, %v1531_v28 }
  0x7a   : > { %4703 = vmatprep.subr.bf16.mxu0 %v5504_v0  ;;  %4717 = vmatprep.subr.bf16.mxu1 %v5504_v0  ;;  %v5271_v29 = vld [vmem:[#allocation2 + $0x34] sm:$0xff]  }
  0x7b   : > { %4711 = vmatprep.mubr.msk.bf16.mxu0 %vm5505_vm0, %v5504_v0  ;;  %4725 = vmatprep.mubr.msk.bf16.mxu1 %vm5505_vm0, %v5504_v0 }
  0x7d   : > { %4704 = vmatpush3.bf16.msra.mxu0 %v5207_v37  ;;  %4718 = vmatpush3.bf16.msra.mxu1 %v5208_v38  ;;  %v5239_v37 = vld [vmem:[%s5616_s13 + $0x18] sm:$0xff]   ;;  %v1541_v38 = vsel %vm253_vm2, %v1536_v34, %v1540_v35 }
  0x7e   : > { %4705 = vmatprep.subr.bf16.mxu0 %v5504_v0  ;;  %4719 = vmatprep.subr.bf16.mxu1 %v5504_v0 }
  0x81   : > { %4706 = vmatpush3.bf16.msra.mxu0 %v5209_v42  ;;  %4720 = vmatpush3.bf16.msra.mxu1 %v5210_v43  ;;  %v5245_v42 = vld [vmem:[#allocation2 + $0xf0] sm:$0xff]   ;;  %v5246_v43 = vld [vmem:[#allocation2 + $0xc4] sm:$0xff]  }
  0x82   : > { %4707 = vmatprep.subr.bf16.mxu0 %v5504_v0  ;;  %4721 = vmatprep.subr.bf16.mxu1 %v5504_v0 }
  0x85   : > { %4708 = vmatpush3.bf16.msra.mxu0 %v5211_v46  ;;  %4722 = vmatpush3.bf16.msra.mxu1 %v5212_v48  ;;  %v5248_v46 = vld [vmem:[#allocation2 + $0xbc] sm:$0xff]  }
  0x86   : > { %4709 = vmatprep.subr.bf16.mxu0 %v5504_v0  ;;  %4723 = vmatprep.subr.bf16.mxu1 %v5504_v0  ;;  %v5249_v48 = vld [vmem:[#allocation2 + $0xe0] sm:$0xff]  }
  0x89   : > { %4710 = vmatpush3.bf16.msra.mxu0 %v5213_v52  ;;  %4724 = vmatpush3.bf16.msra.mxu1 %v5214_v55  ;;  %v1631_v52 = vrot.slane %v4122_v47, 1  ;;  %v5281_v47 = vld [vmem:[#allocation2 + $0x60] sm:$0xff]  }
  0x8a   : > { %4729 = vmatprep.subr.bf16.mxu0 %v5504_v0  ;;  %4743 = vmatprep.subr.bf16.mxu1 %v5504_v0 }
  0x8b   : > { %v1633_v55 = vsel %vm429_vm4, %v1631_v52, %v1632_v49  ;;  %v5283_v49 = vld [vmem:[#allocation2 + $0x58] sm:$0xff]   ;;  %v5285_v52 = vld [vmem:[#allocation2 + $0x50] sm:$0xff]  }
  0x8c   : > { %4712 = vmatmul.mubr.msk.bf16.vlgmr.msra.gmra.mxu0 %vm293_vm3, %v1024_v59  ;;  %4726 = vmatmul.mubr.msk.bf16.vlgmr.msra.gmra.mxu1 %vm293_vm3, %v1178_v60  ;;  %v4139_v59 = vld [vmem:[%s5616_s13 + $0x28] sm:$0xf]  ;;  %v1958_v60 = vsel %vm297_vm1, %v5255_v54, 0  ;;  %v5286_v54 = vld [vmem:[#allocation2 + $0x74] sm:$0xff]  }
  0x8d   : > { %4730 = vmatpush3.bf16.msra.mxu0 %v1283_v61  ;;  %4744 = vmatpush3.bf16.msra.mxu1 %v1373_v62  ;;  %v5256_v61 = vld [vmem:[#allocation2 + $0x114] sm:$0xff]   ;;  %v4141_v62 = vcombine.low %v4138_v58, %v4139_v59 }
  0x8e   : > { %4731 = vmatprep.subr.bf16.mxu0 %v5504_v0  ;;  %4745 = vmatprep.subr.bf16.mxu1 %v5504_v0 }
  0x8f   : > { %4739 = vmatprep.mubr.msk.bf16.mxu0 %vm5505_vm0, %v5504_v0  ;;  %4753 = vmatprep.mubr.msk.bf16.mxu1 %vm5505_vm0, %v5504_v0  ;;  %v1826_v4 = vshll.u32 %v4141_v62, 16  ;;  %v1824_v9 = vshrl.u32 %v4141_v62, 16  ;;  %v5288_v62 = vld [vmem:[#allocation2 + $0x6c] sm:$0xff]  }
  0x91   : > { %4732 = vmatpush3.bf16.msra.mxu0 %v5220_v63  ;;  %4746 = vmatpush3.bf16.msra.mxu1 %v5221_v1  ;;  %v5257_v63 = vld [vmem:[#allocation2 + $0x138] sm:$0xff]   ;;  %v5265_v1 = vld [vmem:[%s5616_s13 + $0x2c] ss:$0 sps:$4 sm:$0x11]  }
  0x92   : > { %4733 = vmatprep.subr.bf16.mxu0 %v5504_v0  ;;  %4747 = vmatprep.subr.bf16.mxu1 %v5504_v0  ;;  %v1831_v7 = vshll.u32 %v5265_v1, 16 }
  0x94   : > { %v1833_v17 = vrot.slane %v1831_v7, 1 }
  0x95   : > { %4734 = vmatpush3.bf16.msra.mxu0 %v5222_v2  ;;  %4748 = vmatpush3.bf16.msra.mxu1 %v5223_v3  ;;  %v5258_v2 = vld [vmem:[#allocation2 + $0x10c] sm:$0xff]  }
  0x96   : > { %4735 = vmatprep.subr.bf16.mxu0 %v5504_v0  ;;  %4749 = vmatprep.subr.bf16.mxu1 %v5504_v0  ;;  %v5259_v3 = vld [vmem:[#allocation2 + $0x130] sm:$0xff]  }
  0x99   : > { %4736 = vmatpush3.bf16.msra.mxu0 %v5224_v5  ;;  %4750 = vmatpush3.bf16.msra.mxu1 %v5225_v6  ;;  %v4149_v5 = vld [vmem:[%s5616_s13 + $0x24] sm:$0xe] }
  0x9a   : > { %4737 = vmatprep.subr.bf16.mxu0 %v5504_v0  ;;  %4751 = vmatprep.subr.bf16.mxu1 %v5504_v0  ;;  %v5260_v6 = vld [vmem:[#allocation2 + $0x104] sm:$0xff]   ;;  %v4150_v11 = vcombine.low %v4149_v5, %v4139_v59  ;;  %v2243_v59 = vrot.slane %v5859_v30, 1  ;;  %v5299_v30 = vld [vmem:[#allocation2 + $0x90] sm:$0xff]  }
  0x9d   : > { %4738 = vmatpush3.bf16.msra.mxu0 %v5226_v10  ;;  %4752 = vmatpush3.bf16.msra.mxu1 %v5227_v12  ;;  %v1828_v10 = vrot.slane %v1826_v4, 1  ;;  %v5268_v12 = vld [vmem:[#allocation2 + $0x20] ss:$0 sps:$4 sm:$0xff]  }
  0x9e   : > { %4757 = vmatprep.subr.bf16.mxu0 %v5504_v0  ;;  %4771 = vmatprep.subr.bf16.mxu1 %v5504_v0  ;;  %v2186_v21 = vsel %vm297_vm1, %v5268_v12, 0 }
  0xa0   : > { %4740 = vmatmul.mubr.msk.bf16.vlgmr.msra.gmra.mxu0 %vm293_vm3, %v5718_v39  ;;  %4754 = vmatmul.mubr.msk.bf16.vlgmr.msra.gmra.mxu1 %vm293_vm3, %v1341_v16  ;;  %v1665_v39 = vsel %vm297_vm1, %v5242_v32, 0  ;;  %v5263_v16 = vld [vmem:[#allocation2 + $0x120] sm:$0xff]   ;;  %v5272_v32 = vld [vmem:[#allocation2 + $0x10] sm:$0xff]  }
  0xa1   : > { %4758 = vmatpush3.bf16.msra.mxu0 %v1465_v14  ;;  %4772 = vmatpush3.bf16.msra.mxu1 %v1573_v15  ;;  %v5262_v14 = vld [vmem:[#allocation2 + $0xfc] sm:$0xff]   ;;  %v1925_v15 = vrot.slane %v5265_v1, 1 }
  0xa2   : > { %4759 = vmatprep.subr.bf16.mxu0 %v5504_v0  ;;  %4773 = vmatprep.subr.bf16.mxu1 %v5504_v0 }
  0xa3   : > { %4767 = vmatprep.mubr.msk.bf16.mxu0 %vm5505_vm0, %v5504_v0  ;;  %4781 = vmatprep.mubr.msk.bf16.mxu1 %vm5505_vm0, %v5504_v0 }
  0xa5   : > { %4760 = vmatpush3.bf16.msra.mxu0 %v5231_v19  ;;  %4774 = vmatpush3.bf16.msra.mxu1 %v5232_v20  ;;  %v1829_v19 = vor.u32 %v1828_v10, %v1824_v9  ;;  %v1924_v20 = vrot.slane %v4150_v11, 1  ;;  %v4196_v10 = vld [vmem:[%s5616_s13 + $0x24] sm:$0xf]  ;;  %v4197_v11 = vld [vmem:[%s5616_s13 + $0x28] sm:$0xf] }
  0xa6   : > { %4761 = vmatprep.subr.bf16.mxu0 %v5504_v0  ;;  %4775 = vmatprep.subr.bf16.mxu1 %v5504_v0 }
  0xa7   : > { %v1926_v25 = vsel %vm429_vm4, %v1924_v20, %v1925_v15  ;;  %v4199_v15 = vcombine.low %v4196_v10, %v4197_v11  ;;  %v5296_v20 = vld [vmem:[#allocation2 + $0xc4] sm:$0xff]  }
  0xa8   : > { %v5318_v10 = vld [vmem:[#allocation2 + $0x44] ss:$0 sps:$4 sm:$0xff]  }
  0xa9   : > { %4762 = vmatpush3.bf16.msra.mxu0 %v5233_v23  ;;  %4776 = vmatpush3.bf16.msra.mxu1 %v5234_v24  ;;  %v5843_v23 = vld [vmem:[%s5616_s13 + $0x1c] sm:$0xf]  ;;  %v1834_v24 = vsel %vm253_vm2, %v1829_v19, %v1833_v17  ;;  %v5295_v17 = vld [vmem:[#allocation2 + $0xa0] sm:$0xff]   ;;  %v2436_v19 = vshll.u32 %v4199_v15, 16 }
  0xaa   : > { %4763 = vmatprep.subr.bf16.mxu0 %v5504_v0  ;;  %4777 = vmatprep.subr.bf16.mxu1 %v5504_v0  ;;  %v4165_v28 = vcombine.low %v4162_v22, %v5843_v23  ;;  %v5297_v22 = vld [vmem:[#allocation2 + $0x98] sm:$0xff]  }
  0xac   : > { %v2071_v34 = vshrl.u32 %v4165_v28, 16 }
  0xad   : > { %4764 = vmatpush3.bf16.msra.mxu0 %v5235_v26  ;;  %4778 = vmatpush3.bf16.msra.mxu1 %v5236_v27  ;;  %v5269_v26 = vld [vmem:[#allocation2 + $0x3c] sm:$0xff]  }
  0xae   : > { %4765 = vmatprep.subr.bf16.mxu0 %v5504_v0  ;;  %4779 = vmatprep.subr.bf16.mxu1 %v5504_v0  ;;  %v5270_v27 = vld [vmem:[#allocation2 + $0x18] sm:$0xff]  }
  0xb1   : > { %4766 = vmatpush3.bf16.msra.mxu0 %v5237_v31  ;;  %4780 = vmatpush3.bf16.msra.mxu1 %v5238_v33  ;;  %v2073_v31 = vshll.u32 %v4165_v28, 16  ;;  %v5273_v33 = vld [vmem:[#allocation2 + $0x2c] sm:$0xff]  }
  0xb2   : > { %4785 = vmatprep.subr.bf16.mxu0 %v5504_v0  ;;  %4799 = vmatprep.subr.bf16.mxu1 %v5504_v0 }
  0xb3   : > { %v2075_v35 = vrot.slane %v2073_v31, 1 }
  0xb4   : > { %4768 = vmatmul.mubr.msk.bf16.vlgmr.msra.gmra.mxu0 %vm293_vm3, %v5239_v37  ;;  %4782 = vmatmul.mubr.msk.bf16.vlgmr.msra.gmra.mxu1 %vm293_vm3, %v1541_v38  ;;  %v5274_v37 = vld [vmem:[#allocation2 + $0x8] sm:$0xff]  }
  0xb5   : > { %4786 = vmatpush3.bf16.msra.mxu0 %v1665_v39  ;;  %4800 = vmatpush3.bf16.msra.mxu1 %v1758_v40  ;;  %v5275_v38 = vld [vmem:[#allocation2 + $0x24] sm:$0xff]  }
  0xb6   : > { %4787 = vmatprep.subr.bf16.mxu0 %v5504_v0  ;;  %4801 = vmatprep.subr.bf16.mxu1 %v5504_v0  ;;  %v5279_v39 = vld [vmem:[#allocation2 + $0x68] ss:$0 sps:$4 sm:$0xff]   ;;  %v5276_v40 = vld [vmem:[#allocation2] sm:$0xff]  }
  0xb7   : > { %4795 = vmatprep.mubr.msk.bf16.mxu0 %vm5505_vm0, %v5504_v0  ;;  %4809 = vmatprep.mubr.msk.bf16.mxu1 %vm5505_vm0, %v5504_v0  ;;  %v2276_v45 = vsel %vm297_vm1, %v5279_v39, 0  ;;  %v5305_v39 = vld [vmem:[#allocation2 + $0x11c] ss:$0 sps:$4 sm:$0xff]  }
  0xb9   : > { %4788 = vmatpush3.bf16.msra.mxu0 %v5244_v41  ;;  %4802 = vmatpush3.bf16.msra.mxu1 %v5245_v42  ;;  %v2076_v41 = vor.u32 %v2075_v35, %v2071_v34  ;;  %v2080_v42 = vrot.slane %v2078_v36, 1  ;;  %v5300_v34 = vld [vmem:[#allocation2 + $0xb4] sm:$0xff]  }
  0xba   : > { %4789 = vmatprep.subr.bf16.mxu0 %v5504_v0  ;;  %4803 = vmatprep.subr.bf16.mxu1 %v5504_v0 }
  0xbd   : > { %4790 = vmatpush3.bf16.msra.mxu0 %v5246_v43  ;;  %4804 = vmatpush3.bf16.msra.mxu1 %v5247_v44  ;;  %v5280_v43 = vld [vmem:[#allocation2 + $0x8c] ss:$0 sps:$4 sm:$0xff]   ;;  %v2081_v44 = vsel %vm253_vm2, %v2076_v41, %v2080_v42 }
  0xbe   : > { %4791 = vmatprep.subr.bf16.mxu0 %v5504_v0  ;;  %4805 = vmatprep.subr.bf16.mxu1 %v5504_v0 }
  0xc1   : > { %4792 = vmatpush3.bf16.msra.mxu0 %v5248_v46  ;;  %4806 = vmatpush3.bf16.msra.mxu1 %v5249_v48  ;;  %v2368_v46 = vsel %vm297_vm1, %v5280_v43, 0  ;;  %v5282_v48 = vld [vmem:[#allocation2 + $0x84] sm:$0xff]  }
  0xc2   : > { %4793 = vmatprep.subr.bf16.mxu0 %v5504_v0  ;;  %4807 = vmatprep.subr.bf16.mxu1 %v5504_v0 }
  0xc5   : > { %4794 = vmatpush3.bf16.msra.mxu0 %v5250_v51  ;;  %4808 = vmatpush3.bf16.msra.mxu1 %v5251_v53  ;;  %v4179_v51 = vld [vmem:[%s5616_s13 + $0x18] sm:$0xe] }
  0xc6   : > { %4813 = vmatprep.subr.bf16.mxu0 %v5504_v0  ;;  %4827 = vmatprep.subr.bf16.mxu1 %v5504_v0  ;;  %v4180_v53 = vcombine.low %v4179_v51, %v5843_v23  ;;  %v2434_v23 = vshrl.u32 %v4199_v15, 16  ;;  %v5307_v51 = vld [vmem:[#allocation2 + $0x114] sm:$0xff]  }
  0xc8   : > { %4796 = vmatmul.mubr.msk.bf16.vlgmr.msra.gmra.mxu0 %vm293_vm3, %v1633_v55  ;;  %4810 = vmatmul.mubr.msk.bf16.vlgmr.msra.gmra.mxu1 %vm293_vm3, %v5253_v56  ;;  %v2242_v58 = vrot.slane %v4180_v53, 1  ;;  %v5308_v53 = vld [vmem:[#allocation2 + $0xe8] sm:$0xff]  }
  0xc9   : > { %4814 = vmatpush3.bf16.msra.mxu0 %v1866_v57  ;;  %4828 = vmatpush3.bf16.msra.mxu1 %v1958_v60  ;;  %v5287_v57 = vld [vmem:[#allocation2 + $0x48] sm:$0xff]  }
  0xca   : > { %4815 = vmatprep.subr.bf16.mxu0 %v5504_v0  ;;  %4829 = vmatprep.subr.bf16.mxu1 %v5504_v0  ;;  %v2244_v5 = vsel %vm429_vm4, %v2242_v58, %v2243_v59  ;;  %v5311_v58 = vld [vmem:[#allocation2 + $0x104] sm:$0xff]  }
  0xcb   : > { %4823 = vmatprep.mubr.msk.bf16.mxu0 %vm5505_vm0, %v5504_v0  ;;  %4837 = vmatprep.mubr.msk.bf16.mxu1 %vm5505_vm0, %v5504_v0 }
  0xcd   : > { %4816 = vmatpush3.bf16.msra.mxu0 %v5256_v61  ;;  %4830 = vmatpush3.bf16.msra.mxu1 %v5257_v63  ;;  %v5291_v63 = vld [vmem:[#allocation2 + $0xb0] ss:$0 sps:$4 sm:$0xff]  }
  0xce   : > { %4817 = vmatprep.subr.bf16.mxu0 %v5504_v0  ;;  %4831 = vmatprep.subr.bf16.mxu1 %v5504_v0  ;;  %v2476_v9 = vsel %vm297_vm1, %v5291_v63, 0 }
  0xd1   : > { %4818 = vmatpush3.bf16.msra.mxu0 %v5258_v2  ;;  %4832 = vmatpush3.bf16.msra.mxu1 %v5259_v3  ;;  %v5292_v2 = vld [vmem:[#allocation2 + $0xd4] ss:$0 sps:$4 sm:$0xff]  }
  0xd2   : > { %4819 = vmatprep.subr.bf16.mxu0 %v5504_v0  ;;  %4833 = vmatprep.subr.bf16.mxu1 %v5504_v0 }
  0xd5   : > { %4820 = vmatpush3.bf16.msra.mxu0 %v5260_v6  ;;  %4834 = vmatpush3.bf16.msra.mxu1 %v5261_v13  ;;  %v5290_v6 = vld [vmem:[%s5616_s13 + $0x24] sm:$0xff]   ;;  %v2568_v13 = vsel %vm297_vm1, %v5292_v2, 0  ;;  %v5312_v2 = vld [vmem:[#allocation2 + $0xd8] sm:$0xff]  }
  0xd6   : > { %4821 = vmatprep.subr.bf16.mxu0 %v5504_v0  ;;  %4835 = vmatprep.subr.bf16.mxu1 %v5504_v0 }
  0xd9   : > { %4822 = vmatpush3.bf16.msra.mxu0 %v5262_v14  ;;  %4836 = vmatpush3.bf16.msra.mxu1 %v5263_v16  ;;  %v5293_v14 = vld [vmem:[#allocation2 + $0xa8] sm:$0xff]  }
  0xda   : > { %4841 = vmatprep.subr.bf16.mxu0 %v5504_v0  ;;  %4855 = vmatprep.subr.bf16.mxu1 %v5504_v0  ;;  %v5294_v16 = vld [vmem:[#allocation2 + $0xcc] sm:$0xff]  }
  0xdc   : > { %4824 = vmatmul.mubr.msk.bf16.vlgmr.msra.gmra.mxu0 %vm293_vm3, %v1834_v24  ;;  %4838 = vmatmul.mubr.msk.bf16.vlgmr.msra.gmra.mxu1 %vm293_vm3, %v1926_v25  ;;  %v2438_v24 = vrot.slane %v2436_v19, 1  ;;  %v4248_v19 = vld [vmem:[%s5616_s13 + $0x24] sm:$0xf] }
  0xdd   : > { %4842 = vmatpush3.bf16.msra.mxu0 %v2113_v18  ;;  %4856 = vmatpush3.bf16.msra.mxu1 %v2186_v21  ;;  %v5302_v18 = vld [vmem:[%s5616_s13 + $0x2c] ss:$0 sps:$4 sm:$0x11]   ;;  %v4207_v21 = vld [vmem:[%s5616_s13 + $0x24] sm:$0xe] }
  0xde   : > { %4843 = vmatprep.subr.bf16.mxu0 %v5504_v0  ;;  %4857 = vmatprep.subr.bf16.mxu1 %v5504_v0  ;;  %v2441_v25 = vshll.u32 %v5302_v18, 16  ;;  %v2439_v31 = vor.u32 %v2438_v24, %v2434_v23  ;;  %v2535_v36 = vrot.slane %v5302_v18, 1  ;;  %v3016_v18 = vsel %vm297_vm1, %v5318_v10, 0  ;;  %v5321_v24 = vld [vmem:[#allocation2 + $0x130] sm:$0xff]  }
  0xdf   : > { %4851 = vmatprep.mubr.msk.bf16.mxu0 %vm5505_vm0, %v5504_v0  ;;  %4865 = vmatprep.mubr.msk.bf16.mxu1 %vm5505_vm0, %v5504_v0 }
  0xe1   : > { %4844 = vmatpush3.bf16.msra.mxu0 %v5269_v26  ;;  %4858 = vmatpush3.bf16.msra.mxu1 %v5270_v27  ;;  %v5298_v26 = vld [vmem:[#allocation2 + $0xbc] sm:$0xff]   ;;  %v4208_v27 = vcombine.low %v4207_v21, %v4197_v11 }
  0xe2   : > { %4845 = vmatprep.subr.bf16.mxu0 %v5504_v0  ;;  %4859 = vmatprep.subr.bf16.mxu1 %v5504_v0  ;;  %v5319_v21 = vld [vmem:[#allocation2 + $0x138] sm:$0xff]  }
  0xe3   : > { %v2534_v35 = vrot.slane %v4208_v27, 1  ;;  %v5987_v27 = vld [vmem:[%s5616_s13 + $0x2c] ss:$0 sps:$4 sm:$0x11]  }
  0xe5   : > { %4846 = vmatpush3.bf16.msra.mxu0 %v5271_v29  ;;  %4860 = vmatpush3.bf16.msra.mxu1 %v5272_v32  ;;  %v2443_v32 = vrot.slane %v2441_v25, 1  ;;  %v5322_v25 = vld [vmem:[#allocation2 + $0x34] sm:$0xff]  }
  0xe6   : > { %4847 = vmatprep.subr.bf16.mxu0 %v5504_v0  ;;  %4861 = vmatprep.subr.bf16.mxu1 %v5504_v0 }
  0xe7   : > { %v2444_v42 = vsel %vm253_vm2, %v2439_v31, %v2443_v32  ;;  %v5323_v31 = vld [vmem:[#allocation2 + $0x128] sm:$0xff]  }
  0xe9   : > { %4848 = vmatpush3.bf16.msra.mxu0 %v5273_v33  ;;  %4862 = vmatpush3.bf16.msra.mxu1 %v5274_v37  ;;  %v5304_v37 = vld [vmem:[#allocation2 + $0xf8] ss:$0 sps:$4 sm:$0xff]  }
  0xea   : > { %4849 = vmatprep.subr.bf16.mxu0 %v5504_v0  ;;  %4863 = vmatprep.subr.bf16.mxu1 %v5504_v0 }
  0xed   : > { %4850 = vmatpush3.bf16.msra.mxu0 %v5275_v38  ;;  %4864 = vmatpush3.bf16.msra.mxu1 %v5276_v40 }
  0xee   : > { %4869 = vmatprep.subr.bf16.mxu0 %v5504_v0  ;;  %4883 = vmatprep.subr.bf16.mxu1 %v5504_v0 }
  0xf0   : > { %4852 = vmatmul.mubr.msk.bf16.vlgmr.msra.gmra.mxu0 %vm293_vm3, %v2081_v44  ;;  %4866 = vmatmul.mubr.msk.bf16.vlgmr.msra.gmra.mxu1 %vm293_vm3, %v4165_v28  ;;  %v2536_v44 = vsel %vm429_vm4, %v2534_v35, %v2535_v36  ;;  %v2981_v36 = vshll.u32 %v5987_v27, 16 }
  0xf1   : > { %4870 = vmatpush3.bf16.msra.mxu0 %v2276_v45  ;;  %4884 = vmatpush3.bf16.msra.mxu1 %v2368_v46  ;;  %v2661_v45 = vsel %vm297_vm1, %v5304_v37, 0 }
  0xf2   : > { %4871 = vmatprep.subr.bf16.mxu0 %v5504_v0  ;;  %4885 = vmatprep.subr.bf16.mxu1 %v5504_v0 }
  0xf3   : > { %4879 = vmatprep.mubr.msk.bf16.mxu0 %vm5505_vm0, %v5504_v0  ;;  %4893 = vmatprep.mubr.msk.bf16.mxu1 %vm5505_vm0, %v5504_v0 }
  0xf5   : > { %4872 = vmatpush3.bf16.msra.mxu0 %v5281_v47  ;;  %4886 = vmatpush3.bf16.msra.mxu1 %v5282_v48  ;;  %v2769_v47 = vsel %vm297_vm1, %v5305_v39, 0  ;;  %v4224_v48 = vld [vmem:[%s5616_s13 + $0x30] sm:$0xf]  ;;  %v5325_v39 = vld [vmem:[#allocation2 + $0x120] sm:$0xff]  }
  0xf6   : > { %4873 = vmatprep.subr.bf16.mxu0 %v5504_v0  ;;  %4887 = vmatprep.subr.bf16.mxu1 %v5504_v0 }
  0xf9   : > { %4874 = vmatpush3.bf16.msra.mxu0 %v5283_v49  ;;  %4888 = vmatpush3.bf16.msra.mxu1 %v5284_v50  ;;  %v5934_v49 = vld [vmem:[%s5616_s13 + $0x34] sm:$0xf] }
  0xfa   : > { %4875 = vmatprep.subr.bf16.mxu0 %v5504_v0  ;;  %4889 = vmatprep.subr.bf16.mxu1 %v5504_v0  ;;  %v5306_v50 = vld [vmem:[#allocation2 + $0xf0] sm:$0xff]  }
  0xfc   : > { %v335_v55 = vpop.f32.mrf.mxu0  ;;  %v408_v56 = vpop.f32.mrf.mxu1 }
  0xfd   : > { %4876 = vmatpush3.bf16.msra.mxu0 %v5285_v52  ;;  %v5888_v60 = vadd.f32 %v408_v56, %v335_v55  ;;  %4890 = vmatpush3.bf16.msra.mxu1 %v5286_v54  ;;  %v4227_v52 = vcombine.low %v4224_v48, %v5934_v49  ;;  %v5309_v54 = vld [vmem:[#allocation2 + $0x10c] sm:$0xff]   ;;  %v5947_v55 = vld [vmem:[%s5616_s13 + $0x38] ss:$0 sps:$4 sm:$0x11]   ;;  %v5330_v48 = vld [vmem:[#allocation2 + $0x20] ss:$0 sps:$4 sm:$0xff]  }
  0xfe   : > { %v4601_v61 = vpop.f32.mrf.mxu0  ;;  %4877 = vmatprep.subr.bf16.mxu0 %v5504_v0  ;;  %v4615_v1 = vpop.f32.mrf.mxu1  ;;  %4891 = vmatprep.subr.bf16.mxu1 %v5504_v0 }
  0xff   : > { %v2729_v56 = vshll.u32 %v4227_v52, 16  ;;  %v2727_v59 = vshrl.u32 %v4227_v52, 16 }
 0x100   : > { %v338_v3 = vpop.f32.mrf.mxu0  ;;  %v411_v4 = vpop.f32.mrf.mxu1 }
 0x101   : > { %4878 = vmatpush3.bf16.msra.mxu0 %v5287_v57  ;;  %v5894_v7 = vadd.f32 %v411_v4, %v338_v3  ;;  %4892 = vmatpush3.bf16.msra.mxu1 %v5288_v62  ;;  %v5310_v57 = vld [vmem:[#allocation2 + $0xe0] sm:$0xff]   ;;  %v2731_v61 = vrot.slane %v2729_v56, 1  ;;  %v2734_v62 = vshll.u32 %v5947_v55, 16 }
 0x102   : > { %v4602_v8 = vpop.f32.mrf.mxu0  ;;  %4897 = vmatprep.subr.bf16.mxu0 %v5504_v0  ;;  %v4616_v12 = vpop.f32.mrf.mxu1  ;;  %4911 = vmatprep.subr.bf16.mxu1 %v5504_v0  ;;  %v5313_v4 = vld [vmem:[#allocation2 + $0xfc] sm:$0xff]  }
 0x103   : > { %v5317_v8 = vld [vmem:[#allocation2 + $0x140] ss:$0 sps:$4 sm:$0xff]   ;;  %v5314_v12 = vld [vmem:[%s5616_s13 + $0x30] sm:$0xff]  }
 0x104   : > { %4880 = vmatmul.mubr.msk.bf16.vlgmr.msra.gmra.mxu0 %vm293_vm3, %v2244_v5  ;;  %4894 = vmatmul.mubr.msk.bf16.vlgmr.msra.gmra.mxu1 %vm293_vm3, %v5290_v6  ;;  %v2732_v5 = vor.u32 %v2731_v61, %v2727_v59  ;;  %v2736_v6 = vrot.slane %v2734_v62, 1  ;;  %v5332_v62 = vld [vmem:[#allocation2 + $0x18] sm:$0xff]  }
 0x105   : > { %4898 = vmatpush3.bf16.msra.mxu0 %v2476_v9  ;;  %4912 = vmatpush3.bf16.msra.mxu1 %v2568_v13 }
 0x106   : > { %4899 = vmatprep.subr.bf16.mxu0 %v5504_v0  ;;  %4913 = vmatprep.subr.bf16.mxu1 %v5504_v0  ;;  %v2737_v15 = vsel %vm253_vm2, %v2732_v5, %v2736_v6  ;;  %v5336_v6 = vld [vmem:[#allocation2 + $0x8] sm:$0xff]  }
 0x107   : > { %4907 = vmatprep.mubr.msk.bf16.mxu0 %vm5505_vm0, %v5504_v0  ;;  %4921 = vmatprep.mubr.msk.bf16.mxu1 %vm5505_vm0, %v5504_v0 }
 0x109   : > { %4900 = vmatpush3.bf16.msra.mxu0 %v5293_v14  ;;  %4914 = vmatpush3.bf16.msra.mxu1 %v5294_v16  ;;  %v2861_v16 = vsel %vm297_vm1, %v5317_v8, 0 }
 0x10a   : > { %4901 = vmatprep.subr.bf16.mxu0 %v5504_v0  ;;  %4915 = vmatprep.subr.bf16.mxu1 %v5504_v0 }
 0x10d   : > { %4902 = vmatpush3.bf16.msra.mxu0 %v5295_v17  ;;  %4916 = vmatpush3.bf16.msra.mxu1 %v5296_v20  ;;  %v5971_v20 = vld [vmem:[%s5616_s13 + $0x28] sm:$0xf] }
 0x10e   : > { %4903 = vmatprep.subr.bf16.mxu0 %v5504_v0  ;;  %4917 = vmatprep.subr.bf16.mxu1 %v5504_v0  ;;  %v5977_v23 = vcombine.low %v4248_v19, %v5971_v20  ;;  %v3146_v19 = vrot.slane %v5987_v27, 1 }
 0x110   : > { %v5916_v28 = vpop.f32.mrf.mxu0  ;;  %v5918_v29 = vpop.f32.mrf.mxu1 }
 0x111   : > { %4904 = vmatpush3.bf16.msra.mxu0 %v5297_v22  ;;  %4918 = vmatpush3.bf16.msra.mxu1 %v5298_v26  ;;  %v5320_v22 = vld [vmem:[#allocation2 + $0x3c] sm:$0xff]   ;;  %v4235_v26 = vld [vmem:[%s5616_s13 + $0x30] sm:$0xe] }
 0x112   : > { %v4629_v33 = vpop.f32.mrf.mxu0  ;;  %4905 = vmatprep.subr.bf16.mxu0 %v5504_v0  ;;  %v4643_v38 = vpop.f32.mrf.mxu1  ;;  %4919 = vmatprep.subr.bf16.mxu1 %v5504_v0  ;;  %v4236_v32 = vcombine.low %v4235_v26, %v5934_v49  ;;  %v507_v49 = vadd.f32 %v5916_v28, %v5888_v60 }
 0x113   : > { %v5324_v33 = vld [vmem:[#allocation2 + $0x2c] sm:$0xff]  }
 0x114   : > { %v5922_v40 = vpop.f32.mrf.mxu0  ;;  %v5924_v41 = vpop.f32.mrf.mxu1 }
 0x115   : > { %4906 = vmatpush3.bf16.msra.mxu0 %v5299_v30  ;;  %4920 = vmatpush3.bf16.msra.mxu1 %v5300_v34  ;;  %v2976_v30 = vshll.u32 %v5977_v23, 16  ;;  %v2974_v34 = vshrl.u32 %v5977_v23, 16  ;;  %v508_v60 = vadd.f32 %v5922_v40, %v5894_v7 }
 0x116   : > { %v4630_v43 = vpop.f32.mrf.mxu0  ;;  %4925 = vmatprep.subr.bf16.mxu0 %v5504_v0  ;;  %v4644_v46 = vpop.f32.mrf.mxu1  ;;  %4939 = vmatprep.subr.bf16.mxu1 %v5504_v0 }
 0x117   : > { %v2978_v35 = vrot.slane %v2976_v30, 1  ;;  %v2828_v43 = vrot.slane %v5947_v55, 1  ;;  %v602_v7 = vadd.f32 %v5924_v41, %v508_v60  ;;  %v4265_v41 = vld [vmem:[%s5616_s13 + $0x24] sm:$0xe]  ;;  %v5349_v60 = vld [vmem:[#allocation2 + $0x6c] sm:$0xff]  }
 0x118   : > { %4908 = vmatmul.mubr.msk.bf16.vlgmr.msra.gmra.mxu0 %vm293_vm3, %v2444_v42  ;;  %4922 = vmatmul.mubr.msk.bf16.vlgmr.msra.gmra.mxu1 %vm293_vm3, %v2536_v44  ;;  %v2827_v42 = vrot.slane %v4236_v32, 1  ;;  %v4266_v8 = vcombine.low %v4265_v41, %v5971_v20  ;;  %v5341_v20 = vld [vmem:[#allocation2 + $0x8c] ss:$0 sps:$4 sm:$0xff]  }
 0x119   : > { %4926 = vmatpush3.bf16.msra.mxu0 %v2661_v45  ;;  %4940 = vmatpush3.bf16.msra.mxu1 %v2769_v47  ;;  %v5326_v45 = vld [vmem:[#allocation2 + $0x24] sm:$0xff]   ;;  %v2979_v46 = vor.u32 %v2978_v35, %v2974_v34  ;;  %v2983_v47 = vrot.slane %v2981_v36, 1 }
 0x11a   : > { %4927 = vmatprep.subr.bf16.mxu0 %v5504_v0  ;;  %4941 = vmatprep.subr.bf16.mxu1 %v5504_v0 }
 0x11b   : > { %4935 = vmatprep.mubr.msk.bf16.mxu0 %vm5505_vm0, %v5504_v0  ;;  %4949 = vmatprep.mubr.msk.bf16.mxu1 %vm5505_vm0, %v5504_v0  ;;  %v2984_v56 = vsel %vm253_vm2, %v2979_v46, %v2983_v47  ;;  %v5344_v46 = vld [vmem:[#allocation2 + $0xa8] sm:$0xff]  }
 0x11d   : > { %4928 = vmatpush3.bf16.msra.mxu0 %v5306_v50  ;;  %4942 = vmatpush3.bf16.msra.mxu1 %v5307_v51  ;;  %v5331_v51 = vld [vmem:[#allocation2 + $0x68] ss:$0 sps:$4 sm:$0xff]  }
 0x11e   : > { %4929 = vmatprep.subr.bf16.mxu0 %v5504_v0  ;;  %4943 = vmatprep.subr.bf16.mxu1 %v5504_v0  ;;  %v3179_v59 = vsel %vm297_vm1, %v5331_v51, 0 }
 0x121   : > { %4930 = vmatpush3.bf16.msra.mxu0 %v5308_v53  ;;  %4944 = vmatpush3.bf16.msra.mxu1 %v5309_v54  ;;  %v2829_v54 = vsel %vm429_vm4, %v2827_v42, %v2828_v43 }
 0x122   : > { %4931 = vmatprep.subr.bf16.mxu0 %v5504_v0  ;;  %4945 = vmatprep.subr.bf16.mxu1 %v5504_v0 }
 0x124   : > { %v5953_v63 = vpop.f32.mrf.mxu0  ;;  %v5955_v1 = vpop.f32.mrf.mxu1 }
 0x125   : > { %4932 = vmatpush3.bf16.msra.mxu0 %v5310_v57  ;;  %4946 = vmatpush3.bf16.msra.mxu1 %v5311_v58  ;;  %v3089_v57 = vsel %vm297_vm1, %v5330_v48, 0  ;;  %v601_v58 = vadd.f32 %v5918_v29, %v507_v49  ;;  %v5333_v29 = vld [vmem:[#allocation2 + $0x60] sm:$0xff]  }
 0x126   : > { %v4657_v3 = vpop.f32.mrf.mxu0  ;;  %4933 = vmatprep.subr.bf16.mxu0 %v5504_v0  ;;  %v4671_v9 = vpop.f32.mrf.mxu1  ;;  %4947 = vmatprep.subr.bf16.mxu1 %v5504_v0  ;;  %v5345_v48 = vld [vmem:[#allocation2 + $0x7c] sm:$0xff]  }
 0x127   : > { %v710_v61 = vadd.f32 %v5953_v63, %v601_v58  ;;  %v5335_v3 = vld [vmem:[#allocation2 + $0x58] sm:$0xff]   ;;  %v5346_v49 = vld [vmem:[#allocation2 + $0xa0] sm:$0xff]  }
 0x128   : > { %v5959_v11 = vpop.f32.mrf.mxu0  ;;  %v5962_v13 = vpop.f32.mrf.mxu1 }
 0x129   : > { %4934 = vmatpush3.bf16.msra.mxu0 %v5312_v2  ;;  %4948 = vmatpush3.bf16.msra.mxu1 %v5313_v4  ;;  %v803_v40 = vadd.f32 %v5955_v1, %v710_v61  ;;  %v711_v63 = vadd.f32 %v5959_v11, %v602_v7  ;;  %v5334_v2 = vld [vmem:[#allocation2 + $0x10] sm:$0xff]  }
 0x12a   : > { %v4658_v14 = vpop.f32.mrf.mxu0  ;;  %4953 = vmatprep.subr.bf16.mxu0 %v5504_v0  ;;  %v4672_v17 = vpop.f32.mrf.mxu1  ;;  %4967 = vmatprep.subr.bf16.mxu1 %v5504_v0  ;;  %v5337_v1 = vld [vmem:[#allocation2 + $0x50] sm:$0xff]  }
 0x12b   : > { %v804_v5 = vadd.f32 %v5962_v13, %v711_v63  ;;  %v6032_v14 = vld [vmem:[%s6254_s2] ss:$0 sm:$0xff]  ;;  %v5339_v17 = vld [vmem:[#allocation2 + $0x48] sm:$0xff]  }
 0x12c   : > { %4936 = vmatmul.mubr.msk.bf16.vlgmr.msra.gmra.mxu0 %vm293_vm3, %v5314_v12  ;;  %4950 = vmatmul.mubr.msk.bf16.vlgmr.msra.gmra.mxu1 %vm293_vm3, %v2737_v15  ;;  %v5338_v15 = vld [vmem:[#allocation2] sm:$0xff]  }
 0x12d   : > { %4954 = vmatpush3.bf16.msra.mxu0 %v2861_v16  ;;  %4968 = vmatpush3.bf16.msra.mxu1 %v3016_v18  ;;  %v3145_v18 = vrot.slane %v4266_v8, 1  ;;  %v5356_v8 = vld [vmem:[#allocation2 + $0xcc] sm:$0xff]  }
 0x12e   : > { %4955 = vmatprep.subr.bf16.mxu0 %v5504_v0  ;;  %4969 = vmatprep.subr.bf16.mxu1 %v5504_v0 }
 0x12f   : > { %4963 = vmatprep.mubr.msk.bf16.mxu0 %vm5505_vm0, %v5504_v0  ;;  %4977 = vmatprep.mubr.msk.bf16.mxu1 %vm5505_vm0, %v5504_v0  ;;  %v3147_v27 = vsel %vm429_vm4, %v3145_v18, %v3146_v19 }
 0x131   : > { %4956 = vmatpush3.bf16.msra.mxu0 %v5319_v21  ;;  %4970 = vmatpush3.bf16.msra.mxu1 %v5320_v22 }
 0x132   : > { %4957 = vmatprep.subr.bf16.mxu0 %v5504_v0  ;;  %4971 = vmatprep.subr.bf16.mxu1 %v5504_v0 }
 0x135   : > { %4958 = vmatpush3.bf16.msra.mxu0 %v5321_v24  ;;  %4972 = vmatpush3.bf16.msra.mxu1 %v5322_v25  ;;  %v5342_v24 = vld [vmem:[#allocation2 + $0xb0] ss:$0 sps:$4 sm:$0xff]  }
 0x136   : > { %4959 = vmatprep.subr.bf16.mxu0 %v5504_v0  ;;  %4973 = vmatprep.subr.bf16.mxu1 %v5504_v0  ;;  %v3379_v36 = vsel %vm297_vm1, %v5342_v24, 0 }
 0x138   : > { %v890_v37 = vpop.f32.mrf.mxu0  ;;  %v999_v38 = vpop.f32.mrf.mxu1 }
 0x139   : > { %4960 = vmatpush3.bf16.msra.mxu0 %v5323_v31  ;;  %4974 = vmatpush3.bf16.msra.mxu1 %v5324_v33  ;;  %v897_v4 = vadd.f32 %v890_v37, %v803_v40  ;;  %v3271_v33 = vsel %vm297_vm1, %v5341_v20, 0  ;;  %v4282_v37 = vld [vmem:[%s5616_s13 + $0x30] sm:$0xf]  ;;  %v5355_v40 = vld [vmem:[#allocation2 + $0xf8] ss:$0 sps:$4 sm:$0xff]  }
 0x13a   : > { %v4685_v44 = vpop.f32.mrf.mxu0  ;;  %4961 = vmatprep.subr.bf16.mxu0 %v5504_v0  ;;  %v4699_v50 = vpop.f32.mrf.mxu1  ;;  %4975 = vmatprep.subr.bf16.mxu1 %v5504_v0  ;;  %v5362_v20 = vld [vmem:[#allocation2 + $0xb4] sm:$0xff]  }
 0x13b   : > { %v1006_v9 = vadd.f32 %v999_v38, %v897_v4  ;;  %v6054_v38 = vld [vmem:[%s5616_s13 + $0x34] sm:$0xf]  ;;  %v6075_v50 = vld [vmem:[%s5616_s13 + $0x38] ss:$0 sps:$4 sm:$0x11]  }
 0x13c   : > { %v893_v52 = vpop.f32.mrf.mxu0  ;;  %v1002_v53 = vpop.f32.mrf.mxu1  ;;  %v4285_v47 = vcombine.low %v4282_v37, %v6054_v38 }
 0x13d   : > { %4962 = vmatpush3.bf16.msra.mxu0 %v5325_v39  ;;  %4976 = vmatpush3.bf16.msra.mxu1 %v5326_v45  ;;  %v898_v10 = vadd.f32 %v893_v52, %v804_v5  ;;  %v5343_v45 = vld [vmem:[#allocation2 + $0x84] sm:$0xff]   ;;  %v5347_v52 = vld [vmem:[#allocation2 + $0x74] sm:$0xff]  }
 0x13e   : > { %v4686_v55 = vpop.f32.mrf.mxu0  ;;  %4981 = vmatprep.subr.bf16.mxu0 %v5504_v0  ;;  %v4700_v28 = vpop.f32.mrf.mxu1  ;;  %4995 = vmatprep.subr.bf16.mxu1 %v5504_v0  ;;  %v3339_v51 = vshll.u32 %v4285_v47, 16 }
 0x13f   : > { %v1007_v21 = vadd.f32 %v1002_v53, %v898_v10  ;;  %v5348_v53 = vld [vmem:[#allocation2 + $0x98] sm:$0xff]   ;;  %v5358_v10 = vld [vmem:[#allocation2 + $0xc4] sm:$0xff]  }
 0x140   : > { %4964 = vmatmul.mubr.msk.bf16.vlgmr.msra.gmra.mxu0 %vm293_vm3, %v2829_v54  ;;  %4978 = vmatmul.mubr.msk.bf16.vlgmr.msra.gmra.mxu1 %vm293_vm3, %v2984_v56  ;;  %v3337_v54 = vshrl.u32 %v4285_v47, 16  ;;  %v3341_v55 = vrot.slane %v3339_v51, 1  ;;  %v3344_v56 = vshll.u32 %v6075_v50, 16  ;;  %v5369_v47 = vld [vmem:[#allocation2 + $0x138] sm:$0xff]   ;;  %v5371_v51 = vld [vmem:[#allocation2 + $0x130] sm:$0xff]  }
 0x141   : > { %4982 = vmatpush3.bf16.msra.mxu0 %v3089_v57  ;;  %4996 = vmatpush3.bf16.msra.mxu1 %v3179_v59  ;;  %v5350_v59 = vld [vmem:[#allocation2 + $0x90] sm:$0xff]  }
 0x142   : > { %4983 = vmatprep.subr.bf16.mxu0 %v5504_v0  ;;  %4997 = vmatprep.subr.bf16.mxu1 %v5504_v0  ;;  %v3342_v61 = vor.u32 %v3341_v55, %v3337_v54 }
 0x143   : > { %4991 = vmatprep.mubr.msk.bf16.mxu0 %vm5505_vm0, %v5504_v0  ;;  %5005 = vmatprep.mubr.msk.bf16.mxu1 %vm5505_vm0, %v5504_v0 }
 0x145   : > { %4984 = vmatpush3.bf16.msra.mxu0 %v5332_v62  ;;  %4998 = vmatpush3.bf16.msra.mxu1 %v5333_v29  ;;  %v3346_v62 = vrot.slane %v3344_v56, 1  ;;  %v5354_v29 = vld [vmem:[#allocation2 + $0xd4] ss:$0 sps:$4 sm:$0xff]  }
 0x146   : > { %4985 = vmatprep.subr.bf16.mxu0 %v5504_v0  ;;  %4999 = vmatprep.subr.bf16.mxu1 %v5504_v0  ;;  %v3471_v5 = vsel %vm297_vm1, %v5354_v29, 0 }
 0x147   : > { %v3347_v41 = vsel %vm253_vm2, %v3342_v61, %v3346_v62  ;;  %v5374_v62 = vld [vmem:[#allocation2 + $0xfc] sm:$0xff]  }
 0x149   : > { %4986 = vmatpush3.bf16.msra.mxu0 %v5334_v2  ;;  %5000 = vmatpush3.bf16.msra.mxu1 %v5335_v3  ;;  %v5351_v2 = vld [vmem:[%s5616_s13 + $0x30] sm:$0xff]  }
 0x14a   : > { %4987 = vmatprep.subr.bf16.mxu0 %v5504_v0  ;;  %5001 = vmatprep.subr.bf16.mxu1 %v5504_v0 }
 0x14c   : > { %v1092_v11 = vpop.f32.mrf.mxu0  ;;  %v6034_v13 = vpop.f32.mrf.mxu1 }
 0x14d   : > { %v1099_v12 = vadd.f32 %v1092_v11, %v1006_v9  ;;  %4988 = vmatpush3.bf16.msra.mxu0 %v5336_v6  ;;  %5002 = vmatpush3.bf16.msra.mxu1 %v5337_v1  ;;  %v3564_v1 = vsel %vm297_vm1, %v5355_v40, 0  ;;  %v5357_v9 = vld [vmem:[#allocation2 + $0xf0] sm:$0xff]   ;;  %v5359_v11 = vld [vmem:[#allocation2 + $0xe8] sm:$0xff]  }
 0x14e   : > { %v4713_v16 = vpop.f32.mrf.mxu0  ;;  %4989 = vmatprep.subr.bf16.mxu0 %v5504_v0  ;;  %v4727_v22 = vpop.f32.mrf.mxu1  ;;  %5003 = vmatprep.subr.bf16.mxu1 %v5504_v0 }
 0x14f   : > { %v1108_v25 = vadd.f32 %v6032_v14, %v1099_v12  ;;  %v4293_v12 = vld [vmem:[%s5616_s13 + $0x30] sm:$0xe]  ;;  %v3438_v22 = vrot.slane %v6075_v50, 1 }
 0x150   : > { %v1095_v26 = vpop.f32.mrf.mxu0  ;;  %v6044_v31 = vpop.f32.mrf.mxu1  ;;  %v4294_v16 = vcombine.low %v4293_v12, %v6054_v38  ;;  %v4310_v38 = vld [vmem:[%s5616_s13 + $0x3c] sm:$0xf] }
 0x151   : > { %v1100_v30 = vadd.f32 %v1095_v26, %v1007_v21  ;;  %4990 = vmatpush3.bf16.msra.mxu0 %v5338_v15  ;;  %5004 = vmatpush3.bf16.msra.mxu1 %v5339_v17  ;;  %v1128_v39 = vmul.f32 %v1108_v25, %v1108_v25  ;;  %v5360_v15 = vld [vmem:[#allocation2 + $0xbc] sm:$0xff]  }
 0x152   : > { %v4714_v32 = vpop.f32.mrf.mxu0  ;;  %5009 = vmatprep.subr.bf16.mxu0 %v5504_v0  ;;  %v4728_v35 = vpop.f32.mrf.mxu1  ;;  %5023 = vmatprep.subr.bf16.mxu1 %v5504_v0  ;;  %v5361_v17 = vld [vmem:[#allocation2 + $0xe0] sm:$0xff]   ;;  %v3437_v21 = vrot.slane %v4294_v16, 1  ;;  %v5366_v26 = vld [vmem:[#allocation2 + $0x11c] ss:$0 sps:$4 sm:$0xff]  }
 0x153   : > { %v1109_v34 = vadd.f32 %v6032_v14, %v1100_v30  ;;  %v5367_v32 = vld [vmem:[#allocation2 + $0x140] ss:$0 sps:$4 sm:$0xff]   ;;  %v3672_v37 = vsel %vm297_vm1, %v5366_v26, 0 }
 0x154   : > { %4992 = vmatmul.mubr.msk.bf16.vlgmr.msra.gmra.mxu0 %vm293_vm3, %v5977_v23  ;;  %5006 = vmatmul.mubr.msk.bf16.vlgmr.msra.gmra.mxu1 %vm293_vm3, %v3147_v27  ;;  %v5365_v35 = vld [vmem:[%s5616_s13 + $0x3c] sm:$0xff]  }
 0x155   : > { %v4353_v42 = vpack.c.bf16 %v1109_v34, %v1108_v25  ;;  %v6058_v43 = vadd.f32 %v1109_v34, %v1108_v25  ;;  %v1129_v44 = vmul.f32 %v1109_v34, %v1109_v34  ;;  %5010 = vmatpush3.bf16.msra.mxu0 %v3271_v33  ;;  %5024 = vmatpush3.bf16.msra.mxu1 %v3379_v36  ;;  %v5363_v25 = vld [vmem:[#allocation2 + $0xd8] sm:$0xff]  }
 0x156   : > { %5011 = vmatprep.subr.bf16.mxu0 %v5504_v0  ;;  %5025 = vmatprep.subr.bf16.mxu1 %v5504_v0  ;;  %v3439_v34 = vsel %vm429_vm4, %v3437_v21, %v3438_v22 }
 0x157   : > { %4354 = vst [vmem:[%s6063_s27] sm:$0xff] %v4353_v42   ;;  %v6066_v23 = vadd.f32 %v1129_v44, %v1128_v39  ;;  %5019 = vmatprep.mubr.msk.bf16.mxu0 %vm5505_vm0, %v5504_v0  ;;  %5033 = vmatprep.mubr.msk.bf16.mxu1 %vm5505_vm0, %v5504_v0  ;;  %v4311_v39 = vld [vmem:[%s5616_s13 + $0x40] sm:$0xf]  ;;  %v3764_v44 = vsel %vm297_vm1, %v5367_v32, 0 }
 0x159   : > { %5012 = vmatpush3.bf16.msra.mxu0 %v5343_v45  ;;  %5026 = vmatpush3.bf16.msra.mxu1 %v5344_v46  ;;  %v5368_v45 = vld [vmem:[#allocation2 + $0x114] sm:$0xff]   ;;  %v4313_v46 = vcombine.low %v4310_v38, %v4311_v39 }
 0x15a   : > { %5013 = vmatprep.subr.bf16.mxu0 %v5504_v0  ;;  %5027 = vmatprep.subr.bf16.mxu1 %v5504_v0 }
 0x15b   : > { %v3632_v50 = vshll.u32 %v4313_v46, 16  ;;  %v3630_v54 = vshrl.u32 %v4313_v46, 16 }
 0x15d   : > { %5014 = vmatpush3.bf16.msra.mxu0 %v5345_v48  ;;  %5028 = vmatpush3.bf16.msra.mxu1 %v5346_v49  ;;  %v5370_v48 = vld [vmem:[#allocation2 + $0x10c] sm:$0xff]   ;;  %v5377_v49 = vld [vmem:[%s5616_s13 + $0x44] ss:$0 sps:$4 sm:$0x11]   ;;  %v3634_v55 = vrot.slane %v3632_v50, 1 }
 0x15e   : > { %5015 = vmatprep.subr.bf16.mxu0 %v5504_v0  ;;  %5029 = vmatprep.subr.bf16.mxu1 %v5504_v0  ;;  %v3637_v56 = vshll.u32 %v5377_v49, 16 }
 0x15f   : > { %v3635_v29 = vor.u32 %v3634_v55, %v3630_v54 }
 0x160   : > { %v6081_v57 = vpop.f32.mrf.mxu0  ;;  %v6083_v58 = vpop.f32.mrf.mxu1 }
 0x161   : > { %5016 = vmatpush3.bf16.msra.mxu0 %v5347_v52  ;;  %5030 = vmatpush3.bf16.msra.mxu1 %v5348_v53  ;;  %v4321_v52 = vld [vmem:[%s5616_s13 + $0x3c] sm:$0xe]  ;;  %v5372_v53 = vld [vmem:[#allocation2 + $0x104] sm:$0xff]  }
 0x162   : > { %v4741_v28 = vpop.f32.mrf.mxu0  ;;  %5017 = vmatprep.subr.bf16.mxu0 %v5504_v0  ;;  %v4755_v7 = vpop.f32.mrf.mxu1  ;;  %5031 = vmatprep.subr.bf16.mxu1 %v5504_v0 }
 0x163   : > { %v4322_v28 = vcombine.low %v4321_v52, %v4311_v39  ;;  %v3639_v7 = vrot.slane %v3637_v56, 1 }
 0x164   : > { %v6087_v63 = vpop.f32.mrf.mxu0  ;;  %v6090_v3 = vpop.f32.mrf.mxu1 }
 0x165   : > { %5018 = vmatpush3.bf16.msra.mxu0 %v5349_v60  ;;  %5032 = vmatpush3.bf16.msra.mxu1 %v5350_v59  ;;  %v5373_v60 = vld [vmem:[#allocation2 + $0x128] sm:$0xff]  }
 0x166   : > { %v4742_v4 = vpop.f32.mrf.mxu0  ;;  %5037 = vmatprep.subr.bf16.mxu0 %v5504_v0  ;;  %v4756_v6 = vpop.f32.mrf.mxu1  ;;  %5051 = vmatprep.subr.bf16.mxu1 %v5504_v0 }
 0x167   : > { %v3730_v4 = vrot.slane %v4322_v28, 1 }
 0x168   : > { %5020 = vmatmul.mubr.msk.bf16.vlgmr.msra.gmra.mxu0 %vm293_vm3, %v5351_v2  ;;  %5034 = vmatmul.mubr.msk.bf16.vlgmr.msra.gmra.mxu1 %vm293_vm3, %v3347_v41  ;;  %v5375_v2 = vld [vmem:[#allocation2 + $0x120] sm:$0xff]   ;;  %v3731_v41 = vrot.slane %v5377_v49, 1 }
 0x169   : > { %5038 = vmatpush3.bf16.msra.mxu0 %v3471_v5  ;;  %5052 = vmatpush3.bf16.msra.mxu1 %v3564_v1  ;;  %v1320_v5 = vadd.f32 %v6081_v57, %v6034_v13 }
 0x16a   : > { %5039 = vmatprep.subr.bf16.mxu0 %v5504_v0  ;;  %5053 = vmatprep.subr.bf16.mxu1 %v5504_v0 }
 0x16b   : > { %5047 = vmatprep.mubr.msk.bf16.mxu0 %vm5505_vm0, %v5504_v0  ;;  %5061 = vmatprep.mubr.msk.bf16.mxu1 %vm5505_vm0, %v5504_v0  ;;  %v1416_v12 = vadd.f32 %v6083_v58, %v1320_v5 }
 0x16d   : > { %5040 = vmatpush3.bf16.msra.mxu0 %v5356_v8  ;;  %5054 = vmatpush3.bf16.msra.mxu1 %v5357_v9  ;;  %v3640_v9 = vsel %vm253_vm2, %v3635_v29, %v3639_v7 }
 0x16e   : > { %5041 = vmatprep.subr.bf16.mxu0 %v5504_v0  ;;  %5055 = vmatprep.subr.bf16.mxu1 %v5504_v0 }
 0x171   : > { %5042 = vmatpush3.bf16.msra.mxu0 %v5358_v10  ;;  %5056 = vmatpush3.bf16.msra.mxu1 %v5359_v11  ;;  %v3732_v11 = vsel %vm429_vm4, %v3730_v4, %v3731_v41 }
 0x172   : > { %5043 = vmatprep.subr.bf16.mxu0 %v5504_v0  ;;  %5057 = vmatprep.subr.bf16.mxu1 %v5504_v0 }
 0x174   : > { %v6111_v18 = vpop.f32.mrf.mxu0  ;;  %v6113_v19 = vpop.f32.mrf.mxu1 }
 0x175   : > { %5044 = vmatpush3.bf16.msra.mxu0 %v5360_v15  ;;  %5058 = vmatpush3.bf16.msra.mxu1 %v5361_v17  ;;  %v1323_v15 = vadd.f32 %v6087_v63, %v6044_v31  ;;  %v1508_v13 = vadd.f32 %v6111_v18, %v1416_v12 }
 0x176   : > { %v4769_v24 = vpop.f32.mrf.mxu0  ;;  %5045 = vmatprep.subr.bf16.mxu0 %v5504_v0  ;;  %v4783_v30 = vpop.f32.mrf.mxu1  ;;  %5059 = vmatprep.subr.bf16.mxu1 %v5504_v0 }
 0x177   : > { %v1616_v57 = vadd.f32 %v6113_v19, %v1508_v13 }
 0x178   : > { %v6118_v27 = vpop.f32.mrf.mxu0  ;;  %v6120_v33 = vpop.f32.mrf.mxu1 }
 0x179   : > { %5046 = vmatpush3.bf16.msra.mxu0 %v5362_v20  ;;  %5060 = vmatpush3.bf16.msra.mxu1 %v5363_v25  ;;  %v1121_v25 = vrot.slane %v6058_v43, 4 }
 0x17a   : > { %v4770_v36 = vpop.f32.mrf.mxu0  ;;  %5065 = vmatprep.subr.bf16.mxu0 %v5504_v0  ;;  %v4784_v42 = vpop.f32.mrf.mxu1  ;;  %5079 = vmatprep.subr.bf16.mxu1 %v5504_v0 }
 0x17c   : > { %5048 = vmatmul.mubr.msk.bf16.vlgmr.msra.gmra.mxu0 %vm293_vm3, %v3439_v34  ;;  %5062 = vmatmul.mubr.msk.bf16.vlgmr.msra.gmra.mxu1 %vm293_vm3, %v5365_v35  ;;  %v1122_v35 = vadd.f32 %v1121_v25, %v6058_v43 }
 0x17d   : > { %5066 = vmatpush3.bf16.msra.mxu0 %v3672_v37  ;;  %5080 = vmatpush3.bf16.msra.mxu1 %v3764_v44 }
 0x17e   : > { %5067 = vmatprep.subr.bf16.mxu0 %v5504_v0  ;;  %5081 = vmatprep.subr.bf16.mxu1 %v5504_v0  ;;  %v1123_v44 = vrot.slane %v1122_v35, 2 }
 0x17f   : > { %5075 = vmatprep.mubr.msk.bf16.mxu0 %vm5505_vm0, %v5504_v0  ;;  %5089 = vmatprep.mubr.msk.bf16.mxu1 %vm5505_vm0, %v5504_v0 }
 0x180   : > { %v1124_v52 = vadd.f32 %v1123_v44, %v1122_v35 }
 0x181   : > { %5068 = vmatpush3.bf16.msra.mxu0 %v5368_v45  ;;  %5082 = vmatpush3.bf16.msra.mxu1 %v5369_v47 }
 0x182   : > { %5069 = vmatprep.subr.bf16.mxu0 %v5504_v0  ;;  %5083 = vmatprep.subr.bf16.mxu1 %v5504_v0 }
 0x185   : > { %5070 = vmatpush3.bf16.msra.mxu0 %v5370_v48  ;;  %5084 = vmatpush3.bf16.msra.mxu1 %v5371_v51 }
 0x186   : > { %5071 = vmatprep.subr.bf16.mxu0 %v5504_v0  ;;  %5085 = vmatprep.subr.bf16.mxu1 %v5504_v0 }
 0x188   : > { %v1701_v59 = vpop.f32.mrf.mxu0  ;;  %v1794_v61 = vpop.f32.mrf.mxu1 }
 0x189   : > { %5072 = vmatpush3.bf16.msra.mxu0 %v5372_v53  ;;  %5086 = vmatpush3.bf16.msra.mxu1 %v5373_v60  ;;  %v1708_v20 = vadd.f32 %v1701_v59, %v1616_v57  ;;  %v1125_v60 = vrot.slane %v1124_v52, 1 }
 0x18a   : > { %v4797_v40 = vpop.f32.mrf.mxu0  ;;  %5073 = vmatprep.subr.bf16.mxu0 %v5504_v0  ;;  %v4811_v6 = vpop.f32.mrf.mxu1  ;;  %5087 = vmatprep.subr.bf16.mxu1 %v5504_v0  ;;  %v1417_v0 = vadd.f32 %v6090_v3, %v1323_v15  ;;  %v1131_v3 = vrot.slane %v6066_v23, 4 }
 0x18b   : > { %v1801_v58 = vadd.f32 %v1794_v61, %v1708_v20  ;;  %v1126_v4 = vadd.f32 %v1125_v60, %v1124_v52 }
 0x18c   : > { %v1704_v1 = vpop.f32.mrf.mxu0  ;;  %v1797_v8 = vpop.f32.mrf.mxu1  ;;  %v1509_v17 = vadd.f32 %v6118_v27, %v1417_v0  ;;  %v1132_v39 = vadd.f32 %v1131_v3, %v6066_v23 }
 0x18d   : > { %5074 = vmatpush3.bf16.msra.mxu0 %v5374_v62  ;;  %5088 = vmatpush3.bf16.msra.mxu1 %v5375_v2 }
 0x18e   : > { %v4798_v10 = vpop.f32.mrf.mxu0  ;;  %v4812_v16 = vpop.f32.mrf.mxu1  ;;  %v1617_v21 = vadd.f32 %v6120_v33, %v1509_v17  ;;  %v1133_v49 = vrot.slane %v1132_v39, 2 }
 0x190   : > { %5076 = vmatmul.mubr.msk.bf16.vlgmr.msra.gmra.mxu0 %vm293_vm3, %v3640_v9  ;;  %5090 = vmatmul.mubr.msk.bf16.vlgmr.msra.gmra.mxu1 %vm293_vm3, %v3732_v11  ;;  %v1709_v22 = vadd.f32 %v1704_v1, %v1617_v21  ;;  %v1134_v54 = vadd.f32 %v1133_v49, %v1132_v39 }
 0x192   : > { %v1802_v18 = vadd.f32 %v1797_v8, %v1709_v22  ;;  %v1135_v61 = vrot.slane %v1134_v54, 1 }
 0x194   : > { %v1136_v8 = vadd.f32 %v1135_v61, %v1134_v54 }
 0x19c   : > { %v1902_v24 = vpop.f32.mrf.mxu0  ;;  %v1994_v63 = vpop.f32.mrf.mxu1 }
 0x19d   : > { %v1909_v31 = vadd.f32 %v1902_v24, %v1801_v58 }
 0x19e   : > { %v4825_v26 = vpop.f32.mrf.mxu0  ;;  %v4839_v32 = vpop.f32.mrf.mxu1 }
 0x19f   : > { %v2001_v30 = vadd.f32 %v1994_v63, %v1909_v31 }
 0x1a0   : > { %v1905_v34 = vpop.f32.mrf.mxu0  ;;  %v1997_v27 = vpop.f32.mrf.mxu1 }
 0x1a1   : > { %v1910_v19 = vadd.f32 %v1905_v34, %v1802_v18  ;;  %v2010_v36 = vadd.f32 %v6032_v14, %v2001_v30 }
 0x1a2   : > { %v4826_v33 = vpop.f32.mrf.mxu0  ;;  %v4840_v38 = vpop.f32.mrf.mxu1 }
 0x1a3   : > { %v2002_v37 = vadd.f32 %v1997_v27, %v1910_v19  ;;  %v2031_v45 = vmul.f32 %v2010_v36, %v2010_v36 }
 0x1a5   : > { %v2011_v42 = vadd.f32 %v6032_v14, %v2002_v37 }
 0x1a7   : > { %v4358_v46 = vpack.c.bf16 %v2011_v42, %v2010_v36  ;;  %v2023_v47 = vadd.f32 %v2011_v42, %v2010_v36  ;;  %v2032_v48 = vmul.f32 %v2011_v42, %v2011_v42 }
 0x1a9   : > { %4370 = vst [vmem:[%s6063_s27 + $0x8] sm:$0xff] %v4358_v46   ;;  %v2024_v50 = vrot.slane %v2023_v47, 4  ;;  %v2033_v51 = vadd.f32 %v2032_v48, %v2031_v45 }
 0x1ab   : > { %v2025_v43 = vadd.f32 %v2024_v50, %v2023_v47  ;;  %v2034_v53 = vrot.slane %v2033_v51, 4 }
 0x1ad   : > { %v2026_v55 = vrot.slane %v2025_v43, 2  ;;  %v2035_v56 = vadd.f32 %v2034_v53, %v2033_v51 }
 0x1af   : > { %v2027_v28 = vadd.f32 %v2026_v55, %v2025_v43  ;;  %v2036_v23 = vrot.slane %v2035_v56, 2 }
 0x1b0   : > { %v2149_v59 = vpop.f32.mrf.mxu0  ;;  %v2222_v7 = vpop.f32.mrf.mxu1 }
 0x1b1   : > { %v2028_v62 = vrot.slane %v2027_v28, 1  ;;  %v2037_v29 = vadd.f32 %v2036_v23, %v2035_v56  ;;  %v2223_v40 = vadd.f32 %v2222_v7, %v2149_v59 }
 0x1b2   : > { %v4853_v2 = vpop.f32.mrf.mxu0  ;;  %v4867_v6 = vpop.f32.mrf.mxu1 }
 0x1b3   : > { %v2029_v41 = vadd.f32 %v2028_v62, %v2027_v28  ;;  %v2038_v5 = vrot.slane %v2037_v29, 1 }
 0x1b4   : > { %v2152_v1 = vpop.f32.mrf.mxu0  ;;  %v2225_v11 = vpop.f32.mrf.mxu1 }
 0x1b5   : > { %v6167_v9 = vadd.f32 %v2029_v41, %v1126_v4  ;;  %v2039_v10 = vadd.f32 %v2038_v5, %v2037_v29  ;;  %v2226_v12 = vadd.f32 %v2225_v11, %v2152_v1 }
 0x1b6   : > { %v4854_v15 = vpop.f32.mrf.mxu0  ;;  %v4868_v16 = vpop.f32.mrf.mxu1 }
 0x1b7   : > { %v6169_v13 = vadd.f32 %v2039_v10, %v1136_v8 }
 0x1c4   : > { %v2312_v0 = vpop.f32.mrf.mxu0  ;;  %v2404_v57 = vpop.f32.mrf.mxu1 }
 0x1c5   : > { %v2319_v35 = vadd.f32 %v2312_v0, %v2223_v40 }
 0x1c6   : > { %v4881_v17 = vpop.f32.mrf.mxu0  ;;  %v4895_v20 = vpop.f32.mrf.mxu1 }
 0x1c7   : > { %v2411_v39 = vadd.f32 %v2404_v57, %v2319_v35 }
 0x1c8   : > { %v2315_v21 = vpop.f32.mrf.mxu0  ;;  %v2407_v58 = vpop.f32.mrf.mxu1 }
 0x1c9   : > { %v2320_v42 = vadd.f32 %v2315_v21, %v2226_v12 }
 0x1ca   : > { %v4882_v22 = vpop.f32.mrf.mxu0  ;;  %v4896_v24 = vpop.f32.mrf.mxu1 }
 0x1cb   : > { %v2412_v46 = vadd.f32 %v2407_v58, %v2320_v42 }
 0x1d8   : > { %v2512_v31 = vpop.f32.mrf.mxu0  ;;  %v2604_v63 = vpop.f32.mrf.mxu1 }
 0x1d9   : > { %v2519_v45 = vadd.f32 %v2512_v31, %v2411_v39 }
 0x1da   : > { %v4909_v25 = vpop.f32.mrf.mxu0  ;;  %v4923_v26 = vpop.f32.mrf.mxu1 }
 0x1db   : > { %v2611_v47 = vadd.f32 %v2604_v63, %v2519_v45 }
 0x1dc   : > { %v2515_v18 = vpop.f32.mrf.mxu0  ;;  %v2607_v30 = vpop.f32.mrf.mxu1 }
 0x1dd   : > { %v2520_v48 = vadd.f32 %v2515_v18, %v2412_v46 }
 0x1de   : > { %v4910_v32 = vpop.f32.mrf.mxu0  ;;  %v4924_v34 = vpop.f32.mrf.mxu1 }
 0x1df   : > { %v2612_v50 = vadd.f32 %v2607_v30, %v2520_v48 }
 0x1ec   : > { %v2697_v3 = vpop.f32.mrf.mxu0  ;;  %v2805_v19 = vpop.f32.mrf.mxu1 }
 0x1ed   : > { %v2704_v49 = vadd.f32 %v2697_v3, %v2611_v47 }
 0x1ee   : > { %v4937_v27 = vpop.f32.mrf.mxu0  ;;  %v4951_v33 = vpop.f32.mrf.mxu1 }
 0x1ef   : > { %v2812_v51 = vadd.f32 %v2805_v19, %v2704_v49 }
 0x1f0   : > { %v2700_v36 = vpop.f32.mrf.mxu0  ;;  %v2808_v37 = vpop.f32.mrf.mxu1 }
 0x1f1   : > { %v2705_v52 = vadd.f32 %v2700_v36, %v2612_v50 }
 0x1f2   : > { %v4938_v38 = vpop.f32.mrf.mxu0  ;;  %v4952_v44 = vpop.f32.mrf.mxu1 }
 0x1f3   : > { %v2813_v56 = vadd.f32 %v2808_v37, %v2705_v52 }
 0x200   : > { %v2897_v43 = vpop.f32.mrf.mxu0  ;;  %v3052_v54 = vpop.f32.mrf.mxu1 }
 0x201   : > { %v2904_v53 = vadd.f32 %v2897_v43, %v2812_v51 }
 0x202   : > { %v4965_v55 = vpop.f32.mrf.mxu0  ;;  %v4979_v60 = vpop.f32.mrf.mxu1 }
 0x203   : > { %v2913_v23 = vadd.f32 %v6032_v14, %v2904_v53 }
 0x204   : > { %v2900_v28 = vpop.f32.mrf.mxu0  ;;  %v3055_v61 = vpop.f32.mrf.mxu1 }
 0x205   : > { %v2905_v59 = vadd.f32 %v2900_v28, %v2813_v56  ;;  %v2934_v40 = vmul.f32 %v2913_v23, %v2913_v23 }
 0x206   : > { %v4966_v62 = vpop.f32.mrf.mxu0  ;;  %v4980_v7 = vpop.f32.mrf.mxu1 }
 0x207   : > { %v2914_v29 = vadd.f32 %v6032_v14, %v2905_v59 }
 0x209   : > { %v4363_v2 = vpack.c.bf16 %v2914_v29, %v2913_v23  ;;  %v2926_v4 = vadd.f32 %v2914_v29, %v2913_v23  ;;  %v2935_v41 = vmul.f32 %v2914_v29, %v2914_v29 }
 0x20b   : > { %4371 = vst [vmem:[%s6063_s27 + $0x10] sm:$0xff] %v4363_v2   ;;  %v2927_v5 = vrot.slane %v2926_v4, 4  ;;  %v2936_v6 = vadd.f32 %v2935_v41, %v2934_v40 }
 0x20d   : > { %v2928_v1 = vadd.f32 %v2927_v5, %v2926_v4  ;;  %v2937_v8 = vrot.slane %v2936_v6, 4 }
 0x20f   : > { %v2929_v10 = vrot.slane %v2928_v1, 2  ;;  %v2938_v11 = vadd.f32 %v2937_v8, %v2936_v6 }
 0x211   : > { %v2930_v12 = vadd.f32 %v2929_v10, %v2928_v1  ;;  %v2939_v15 = vrot.slane %v2938_v11, 2 }
 0x213   : > { %v2931_v16 = vrot.slane %v2930_v12, 1  ;;  %v2940_v0 = vadd.f32 %v2939_v15, %v2938_v11 }
 0x214   : > { %v3125_v57 = vpop.f32.mrf.mxu0  ;;  %v3215_v21 = vpop.f32.mrf.mxu1 }
 0x215   : > { %v2932_v17 = vadd.f32 %v2931_v16, %v2930_v12  ;;  %v2941_v20 = vrot.slane %v2940_v0, 1 }
 0x216   : > { %v4993_v58 = vpop.f32.mrf.mxu0  ;;  %v5007_v24 = vpop.f32.mrf.mxu1 }
 0x217   : > { %v2942_v22 = vadd.f32 %v2941_v20, %v2940_v0  ;;  %v6175_v31 = vadd.f32 %v2932_v17, %v6167_v9  ;;  %v3126_v9 = vadd.f32 %v3125_v57, %v3052_v54 }
 0x218   : > { %v3128_v63 = vpop.f32.mrf.mxu0  ;;  %v3218_v25 = vpop.f32.mrf.mxu1 }
 0x219   : > { %v6178_v26 = vadd.f32 %v2942_v22, %v6169_v13  ;;  %v3222_v13 = vadd.f32 %v3215_v21, %v3126_v9  ;;  %v3129_v47 = vadd.f32 %v3128_v63, %v3055_v61 }
 0x21a   : > { %v4994_v18 = vpop.f32.mrf.mxu0  ;;  %v5008_v30 = vpop.f32.mrf.mxu1 }
 0x21b   : > { %v3223_v50 = vadd.f32 %v3218_v25, %v3129_v47 }
 0x228   : > { %v3307_v32 = vpop.f32.mrf.mxu0  ;;  %v3415_v34 = vpop.f32.mrf.mxu1 }
 0x229   : > { %v3314_v49 = vadd.f32 %v3307_v32, %v3222_v13 }
 0x22a   : > { %v5021_v3 = vpop.f32.mrf.mxu0  ;;  %v5035_v19 = vpop.f32.mrf.mxu1 }
 0x22b   : > { %v3422_v51 = vadd.f32 %v3415_v34, %v3314_v49 }
 0x22c   : > { %v3310_v27 = vpop.f32.mrf.mxu0  ;;  %v3418_v35 = vpop.f32.mrf.mxu1 }
 0x22d   : > { %v3315_v52 = vadd.f32 %v3310_v27, %v3223_v50 }
 0x22e   : > { %v5022_v33 = vpop.f32.mrf.mxu0  ;;  %v5036_v36 = vpop.f32.mrf.mxu1 }
 0x22f   : > { %v3423_v53 = vadd.f32 %v3418_v35, %v3315_v52 }
 0x23c   : > { %v3507_v37 = vpop.f32.mrf.mxu0  ;;  %v3600_v38 = vpop.f32.mrf.mxu1 }
 0x23d   : > { %v3514_v43 = vadd.f32 %v3507_v37, %v3422_v51 }
 0x23e   : > { %v5049_v39 = vpop.f32.mrf.mxu0  ;;  %v5063_v42 = vpop.f32.mrf.mxu1 }
 0x23f   : > { %v3607_v55 = vadd.f32 %v3600_v38, %v3514_v43 }
 0x240   : > { %v3510_v44 = vpop.f32.mrf.mxu0  ;;  %v3603_v45 = vpop.f32.mrf.mxu1 }
 0x241   : > { %v3515_v56 = vadd.f32 %v3510_v44, %v3423_v53 }
 0x242   : > { %v5050_v46 = vpop.f32.mrf.mxu0  ;;  %v5064_v48 = vpop.f32.mrf.mxu1 }
 0x243   : > { %v3608_v59 = vadd.f32 %v3603_v45, %v3515_v56 }
 0x250   : > { %v3708_v60 = vpop.f32.mrf.mxu0  ;;  %v3800_v54 = vpop.f32.mrf.mxu1 }
 0x251   : > { %v3715_v28 = vadd.f32 %v3708_v60, %v3607_v55 }
 0x252   : > { %v5077_v23 = vpop.f32.mrf.mxu0  ;;  %v5091_v29 = vpop.f32.mrf.mxu1 }
 0x253   : > { %v3807_v62 = vadd.f32 %v3800_v54, %v3715_v28 }
 0x254   : > { %v3711_v7 = vpop.f32.mrf.mxu0  ;;  %v3803_v40 = vpop.f32.mrf.mxu1 }
 0x255   : > { %v3716_v61 = vadd.f32 %v3711_v7, %v3608_v59  ;;  %v3816_v4 = vadd.f32 %v6032_v14, %v3807_v62 }
 0x256   : > { %v5078_v2 = vpop.f32.mrf.mxu0  ;;  %v5092_v5 = vpop.f32.mrf.mxu1 }
 0x257   : > { %v3808_v41 = vadd.f32 %v3803_v40, %v3716_v61  ;;  %v3837_v1 = vmul.f32 %v3816_v4, %v3816_v4 }
 0x259   : > { %v3817_v6 = vadd.f32 %v6032_v14, %v3808_v41 }
 0x25b   : > { %v4368_v8 = vpack.c.bf16 %v3817_v6, %v3816_v4  ;;  %v3829_v10 = vadd.f32 %v3817_v6, %v3816_v4  ;;  %v3838_v11 = vmul.f32 %v3817_v6, %v3817_v6 }
 0x25d   : > { %4372 = vst [vmem:[%s6063_s27 + $0x18] sm:$0xff] %v4368_v8   ;;  %v3830_v12 = vrot.slane %v3829_v10, 4  ;;  %v3839_v15 = vadd.f32 %v3838_v11, %v3837_v1 }
 0x25e   : > { %5418 = shalt.err (!%p5415_p0)
}
 0x25f   : > { %s5419_s12 = scalar_lea.hbm %s6189_s6, 512  ;;  %s5423_s20 = scalar_lea.hbm %s6255_s3, 1024 }
 0x260   : > { %p5420_p1 = scmp.ne.s32.totalorder %s6189_s6, %s5419_s12  ;;  %p5424_p4 = scmp.lt.s32.totalorder %s6189_s6, %s6255_s3 }
 0x261   : > { %p5425_p7 = scmp.lt.s32.totalorder %s5423_s20, %s5419_s12 }
 0x262   : > { %p5421_p2 = pnand %p5420_p1, %p5573_p5 }
 0x263   : > { %p5426_p6 = por %p5425_p7, %p5424_p4 }
 0x264   : > { %p5422_p3 = pneg %p5421_p2 }
 0x266   : > { %p5427_p8 = pnand %p5426_p6, %p5422_p3 }
 0x268   : > { %5430 = shalt.err (!%p5427_p8)
}
 0x269   : > { %s5507_s29 = smov 64   ;;  %s5508_s30 = smov 4   ;;  %v3831_v14 = vadd.f32 %v3830_v12, %v3829_v10  ;;  %v3840_v16 = vrot.slane %v3839_v15, 4 }
 0x26a   : > { %5098 = dma.vmem_to_hbm [thread:$0]  (%p5573_p5), %s6183_s28, 512, %s6189_s6, %s3850_s7, %s5507_s29, %s5507_s29, %s5508_s30  }
 0x26b   : > { %v3832_v0 = vrot.slane %v3831_v14, 2  ;;  %v3841_v57 = vadd.f32 %v3840_v16, %v3839_v15  ;;  %s3994_s5 = sshll.u32 %s6037_s22, 1  ;;  %s4338_s8 = sshll.u32 %s5556_s19, 5 }
 0x26c   : > { %s216_s9 = scalar_lea.vmem [#allocation6], %s3994_s5  ;;  %s3882_s7 = scalar_lea.hbm %s6256_s4, %s4338_s8 }
 0x26d   : > { %v3833_v17 = vadd.f32 %v3832_v0, %v3831_v14  ;;  %v3842_v20 = vrot.slane %v3841_v57, 2  ;;  %s3884_s10 = sshll.u32 %s216_s9, 4  ;;  %s3855_s11 = scalar_lea.sflag [#allocation7], %s6037_s22  ;;  %s3885_s10 = int_to_ptr.vmem [resolvable:$true] %s3884_s10 }
 0x26e   : > { %s5431_s12 = scalar_lea.vmem %s3885_s10, 32  ;;  %s5509_s19 = smov [#allocation6]  }
 0x26f   : > { %v3834_v21 = vrot.slane %v3833_v17, 1  ;;  %v3843_v58 = vadd.f32 %v3842_v20, %v3841_v57  ;;  %p5432_p9 = scmp.ne.s32.totalorder %s3885_s10, %s5431_s12  ;;  %s5435_s13 = sshll.u32 %s5509_s19, 4  ;;  %s5436_s13 = int_to_ptr.vmem [resolvable:$false] %s5435_s13 }
 0x270   : > { %s5437_s14 = scalar_lea.vmem %s5436_s13, 64  ;;  %p5438_p12 = scmp.lt.s32.totalorder %s3885_s10, %s5436_s13 }
 0x271   : > { %v3835_v22 = vadd.f32 %v3834_v21, %v3833_v17  ;;  %v3844_v24 = vrot.slane %v3843_v58, 1  ;;  %p5433_p10 = pnand %p5432_p9, %p5573_p5  ;;  %p5439_p13 = scmp.lt.s32.totalorder %s5437_s14, %s5431_s12 }
 0x273   : > { %v3836_v63 = vadd.f32 %v3835_v22, %v6175_v31  ;;  %v3845_v25 = vadd.f32 %v3844_v24, %v3843_v58  ;;  %p5434_p11 = pneg %p5433_p10  ;;  %p5440_p0 = por %p5439_p13, %p5438_p12 }
 0x275   : > { %v3846_v18 = vadd.f32 %v3845_v25, %v6178_v26  ;;  %3847 = vst [vmem:[%s216_s9] sm:$0x1] %v3836_v63  ;;  %p5441_p1 = pnand %p5440_p0, %p5434_p11 }
 0x277   : > { %3848 = vst [vmem:[%s216_s9 + $0x1] sm:$0x1] %v3846_v18 }
 0x278   : > { %5444 = shalt.err (!%p5441_p1)
}
 0x279   : > { %s5445_s20 = scalar_lea.hbm %s3882_s7, 32  ;;  %s5449_s27 = scalar_lea.hbm %s6256_s4, 64 }
 0x27a   : > { %p5446_p2 = scmp.ne.s32.totalorder %s3882_s7, %s5445_s20  ;;  %p5450_p7 = scmp.lt.s32.totalorder %s3882_s7, %s6256_s4 }
 0x27b   : > { %p5451_p6 = scmp.lt.s32.totalorder %s5449_s27, %s5445_s20 }
 0x27c   : > { %p5447_p3 = pnand %p5446_p2, %p5573_p5 }
 0x27d   : > { %p5452_p8 = por %p5451_p6, %p5450_p7 }
 0x27e   : > { %p5448_p4 = pneg %p5447_p3 }
 0x280   : > { %p5453_p9 = pnand %p5452_p8, %p5448_p4 }
 0x282   : > { %5456 = shalt.err (!%p5453_p9)
}
 0x283   : > { %5099 = dma.vmem_to_hbm [thread:$0]  (%p5573_p5), %s3885_s10, 32, %s3882_s7, %s3855_s11  }
 0x284 PF: > { %p5115_p10 = scmp.ge.s32.totalorder %s5499_s18, 2  ;;  %s3896_s5 = sand.u32 1, %s5487_s15  }
 0x285   : > { %p6260_p11 = scmp.ne.s32.totalorder %s6258_s26, 0  ;;  %s3897_s8 = scalar_lea.sflag [#allocation4], %s3896_s5 }
 0x287   : > { %p5107_p12 = pnand %p5115_p10, %p6260_p11 }
 0x289   : > { %p5108_p13 = pneg %p5107_p12 }
 0x28b   : > { %5478 = dma.done.wait (%p5108_p13), %s3897_s8, 512  }
 0x28c   : > { %5480 = vsyncadd (%p5108_p13), %s3897_s8, 4294966784  ;;  %s3906_s9 = scalar_lea.sflag [#allocation7], %s3896_s5 }
 0x28d   : > { %5482 = dma.done.wait (%p5108_p13), %s3906_s9, 32  }
 0x28e   : > { %5484 = vsyncadd (%p5108_p13), %s3906_s9, 4294967264  ;;  %p19_p5 = scmp.ge.s32.totalorder %s5560_s21, 4   ;;  %s6261_s15 = smov %s5491_s16 }
 0x28f   : > { %s6262_s16 = smov %s5495_s17  ;;  %s6263_s17 = smov %s5571_s24 }
 0x290   : > { %s6264_s18 = smov %s5560_s21  ;;  %21 = sbr.rel (!%p19_p5) target bundleno = 6 (0x6), region = 105 }
 0x295   :  { %3911 = vsyncpa [#allocation3], 1 }
 0x296   :  { %3913 = vsyncpa [#allocation3 + $0x1], 1 }
 0x297   :  { %3914 = vsyncpa [#allocation4], 1 }
 0x298   :  { %3916 = vsyncpa [#allocation4 + $0x1], 1 }
 0x299   :  { %3917 = vsyncpa [#allocation7], 1 }
 0x29a   :  { %3919 = vsyncpa [#allocation7 + $0x1], 1 }

</bundles_post_ra>
